<compile_context>
chip_gen: v5e
topology: v5e:2x2
jax: 0.10.0
libtpu: 0.0.40
codegen_flags: <defaults>
</compile_context>

<pallas_src>
import functools

import jax
import jax.numpy as jnp
from jax import lax
from jax.experimental import pallas as pl
from jax.experimental.pallas import tpu as pltpu

LEAK = 0.01      # nn.LeakyReLU default negative_slope
BN_EPS = 1e-5    # nn.BatchNorm2d default eps
C1 = 16          # conv1 out channels
C2 = 32          # conv2 out channels
KH = KW = 5      # conv kernel size
STRIDE = 2
POOL = 3


def conv2d_size_out(size, kernel_size=5, stride=2):
    return (size - (kernel_size - 1) - 1) // stride + 1


# ----------------------------- fused Pallas kernel ---------------------------

def _fused_forward_kernel(x1_ref, w1k_ref, b1w_ref, w2k_ref, b2w_ref,
                          w1s_ref, b1s_ref, w2s_ref, b2s_ref, q_ref,
                          *, B, OH1, OH2, PH, A):
    """Whole Dueling_DQN forward for the batch, entirely in VMEM.

    x1_ref : (B*OH1, KH*W*C)        bf16  pre-gathered conv1 input rows; row index is
                                          (parity p, m, b) with conv1 row = 2m+p
    w1k_ref: (KH*W*C, OW1*C1)       bf16  structured conv1 weights (BN folded)
    b1w_ref: (1, OW1*C1)            f32
    w2k_ref: (KH, OW1*C1, OW2*C2)   bf16  structured conv2 weights (BN folded)
    b2w_ref: (1, OW2*C2)            f32
    w1s_ref: (PH, L, 2*hidden)      bf16  stacked value||advantage first Linear with the
                                          pool pw-selection / flatten-order folded in
    b1s_ref: (1, 2*hidden)          f32
    w2s_ref: (2*hidden, 2*A)        bf16  block-diagonal stacked second Linear
    b2s_ref: (1, 2*A)               f32
    q_ref  : (B, A)                 f32
    """
    lrelu = lambda t: jnp.where(t > 0, t, LEAK * t)
    half = OH1 // 2
    M2 = OH2 * B
    L = w1s_ref.shape[1]

    # --- conv1 (+ folded BN + LeakyReLU): one MXU dot, M = B*OH1 (batch and
    #     output-row parity fused), K = KH*W*C (kernel rows gathered by wrapper).
    z1 = jnp.dot(x1_ref[...], w1k_ref[...], preferred_element_type=jnp.float32)
    z1 = lrelu(z1 + b1w_ref[...]).astype(jnp.bfloat16)     # rows: (parity, m, b)

    # --- conv2 (+ folded BN + LeakyReLU): the parity-major z1 layout makes
    #     every kernel-row operand a contiguous (B*OH2)-row block.
    acc2 = None
    for di in range(KH):
        start = (di % 2) * half * B + (di // 2) * B
        d = jnp.dot(z1[start:start + M2], w2k_ref[di],
                    preferred_element_type=jnp.float32)
        acc2 = d if acc2 is None else acc2 + d
    z2 = lrelu(acc2 + b2w_ref[...])            # rows: (oh2, b); lanes: (ow2, c2)

    # --- 3x3 max-pool + stacked value||advantage first Linear.  Sublane max
    #     over the 3 pool rows, lane max over three L-lane shifted windows; the
    #     pooled pw-block selection and torch's (c, ph, pw) flatten order live
    #     in zero/permuted rows of w1s, so no per-window slicing or lane concat.
    acc_h = None
    for ph in range(PH):
        r = z2[(POOL * ph) * B:(POOL * ph + 1) * B]
        for j in range(1, POOL):
            r = jnp.maximum(r, z2[(POOL * ph + j) * B:(POOL * ph + j + 1) * B])
        lm = r[:, 0:L]
        for j in range(1, POOL):
            lm = jnp.maximum(lm, r[:, j * C2:j * C2 + L])
        d = jnp.dot(lm.astype(jnp.bfloat16), w1s_ref[ph],
                    preferred_element_type=jnp.float32)
        acc_h = d if acc_h is None else acc_h + d
    h = lrelu(acc_h + b1s_ref[...])            # (B, 2*hidden)

    # --- block-diagonal stacked second Linear + dueling combine.
    o = jnp.dot(h.astype(jnp.bfloat16), w2s_ref[...],
                preferred_element_type=jnp.float32) + b2s_ref[...]
    v = o[:, :A]
    a = o[:, A:2 * A]
    q_ref[...] = v + (a - jnp.mean(a))         # global scalar mean, as in torch


# ------------------------------- JAX wrappers ---------------------------------

def prepare_params(p, H, W):
    """Fold BN, build bf16 structured conv weights and stacked head weights."""
    OH1, OW1 = conv2d_size_out(H), conv2d_size_out(W)
    OH2, OW2 = conv2d_size_out(OH1), conv2d_size_out(OW1)
    PH, PW = OH2 // POOL, OW2 // POOL
    C = p["w1"].shape[1]
    hidden = p["wv1"].shape[0]
    A = p["wv2"].shape[0]
    L = (OW2 - POOL + 1) * C2
    f32 = lambda a: a.astype(jnp.float32)
    bf16 = lambda a: a.astype(jnp.bfloat16)

    assert STRIDE * (OW1 - 1) + KW <= W and STRIDE * (OW2 - 1) + KW <= OW1

    # Fold eval-mode BatchNorm into the conv weights / bias.
    s1 = f32(p["g1"]) * lax.rsqrt(f32(p["var1"]) + BN_EPS)
    w1e = f32(p["w1"]) * s1[:, None, None, None]
    b1e = (f32(p["b1"]) - f32(p["mu1"])) * s1 + f32(p["beta1"])
    s2 = f32(p["g2"]) * lax.rsqrt(f32(p["var2"]) + BN_EPS)
    w2e = f32(p["w2"]) * s2[:, None, None, None]
    b2e = (f32(p["b2"]) - f32(p["mu2"])) * s2 + f32(p["beta2"])

    # Structured "wide-row" conv weights: Wk[k][iw*Cin + ci, ow*Cout + co] =
    # w_eff[co, ci, k, iw - 2*ow] (zero outside the kernel support), so
    # input_row_block @ Wk[k] yields a lane-dense (ow, co)-packed output row.
    def widen(w_eff, Cin, Cout, Win, Wout):
        blk = jnp.transpose(w_eff, (2, 3, 1, 0)).reshape(KH, KW * Cin, Cout)
        wk = jnp.zeros((KH, Win * Cin, Wout * Cout), jnp.float32)
        for ow in range(Wout):
            wk = wk.at[:, STRIDE * ow * Cin:(STRIDE * ow + KW) * Cin,
                       ow * Cout:(ow + 1) * Cout].set(blk)
        return wk

    # conv1: collapse the kernel-row axis into K so the kernel does ONE dot.
    w1k = widen(w1e, C, C1, W, OW1).reshape(KH * W * C, OW1 * C1)
    w2k = widen(w2e, C1, C2, OW1, OW2)
    b1w = jnp.tile(b1e, OW1).reshape(1, OW1 * C1)
    b2w = jnp.tile(b2e, OW2).reshape(1, OW2 * C2)

    # Stacked heads.  The pool's pw-block selection and the permutation from
    # torch's (c, ph, pw) flatten order into the kernel's lane-packed (pw, c)
    # order are folded into zero / permuted rows of w1s (one (L, 2H) slab per ph).
    wcat_t = jnp.concatenate([f32(p["wv1"]), f32(p["wa1"])], axis=0).T  # (lin_in, 2H)
    w1s = jnp.zeros((PH, L, 2 * hidden), jnp.float32)
    for ph in range(PH):
        for pw in range(PW):
            block = wcat_t[ph * PW + pw::PH * PW, :]           # rows over c2
            w1s = w1s.at[ph, POOL * pw * C2:POOL * pw * C2 + C2, :].set(block)
    b1s = jnp.concatenate([f32(p["bv1"]), f32(p["ba1"])]).reshape(1, 2 * hidden)
    w2s = jnp.zeros((2 * hidden, 2 * A), jnp.float32)
    w2s = w2s.at[:hidden, :A].set(f32(p["wv2"]).T)
    w2s = w2s.at[hidden:, A:].set(f32(p["wa2"]).T)
    b2s = jnp.concatenate([f32(p["bv2"]), f32(p["ba2"])]).reshape(1, 2 * A)

    return {"w1k": bf16(w1k), "b1w": b1w, "w2k": bf16(w2k), "b2w": b2w,
            "w1s": bf16(w1s), "b1s": b1s, "w2s": bf16(w2s), "b2s": b2s}


def dueling_dqn_forward(x, kp):
    """x: (B, C, H, W) float32 NCHW; kp: kernel-ready params from prepare_params."""
    B, C, H, W = x.shape
    OH1, OW1 = conv2d_size_out(H), conv2d_size_out(W)
    OH2, OW2 = conv2d_size_out(OH1), conv2d_size_out(OW1)
    PH, PW = OH2 // POOL, OW2 // POOL
    A = kp["w2s"].shape[1] // 2
    assert OH1 % 2 == 0, "conv1 output height must be even for the parity split"
    assert PH >= 1 and PW >= 1, "input too small for conv/conv/pool stack"

    # Lane-pack rows as (w, c) and pre-gather, for every conv1 output row, the
    # KH input rows it needs -- batch and conv1-row parity fused into the
    # matmul M dimension (parity-major so conv2's stride-2 row accesses become
    # contiguous blocks in-kernel), kernel rows concatenated along K.
    # TODO(synk): store replay-buffer frames pre-packed in this layout to avoid
    # the per-call transpose/gather (it fuses into this jit, but is still an
    # extra XLA op on a latency-bound forward).
    xp = jnp.transpose(x, (0, 2, 3, 1)).reshape(B, H, W * C)
    rows = (4 * jnp.arange(OH1 // 2)[None, None, :]
            + 2 * jnp.arange(2)[None, :, None]
            + jnp.arange(KH)[:, None, None])               # (KH, 2, OH1//2)
    x1 = xp[:, rows, :]                                    # (B, KH, 2, OH1//2, W*C)
    x1 = jnp.transpose(x1, (2, 3, 0, 1, 4)).reshape(OH1 * B, KH * W * C)
    x1 = x1.astype(jnp.bfloat16)

    kernel = functools.partial(_fused_forward_kernel, B=B, OH1=OH1, OH2=OH2,
                               PH=PH, A=A)
    vmem = pl.BlockSpec(memory_space=pltpu.MemorySpace.VMEM)
    return pl.pallas_call(
        kernel,
        out_shape=jax.ShapeDtypeStruct((B, A), jnp.float32),
        in_specs=[vmem] * 9,
        out_specs=vmem,
    )(x1, kp["w1k"], kp["b1w"], kp["w2k"], kp["b2w"],
      kp["w1s"], kp["b1s"], kp["w2s"], kp["b2s"])


# ------------------------- deterministic parameters --------------------------

def init_params(key, channels, hidden, nb_actions, lin_in):
    ks = jax.random.split(key, 12)

    def u(k, shape, fan_in):
        bound = 1.0 / jnp.sqrt(jnp.float32(fan_in))
        return jax.random.uniform(k, shape, jnp.float32, -bound, bound)

    p = {
        "w1": u(ks[0], (16, channels, 5, 5), channels * 25),
        "b1": u(ks[1], (16,), channels * 25),
        "w2": u(ks[2], (32, 16, 5, 5), 16 * 25),
        "b2": u(ks[3], (32,), 16 * 25),
        # BatchNorm2d params / running stats (eval mode, fresh init)
        "g1": jnp.ones((16,), jnp.float32), "beta1": jnp.zeros((16,), jnp.float32),
        "mu1": jnp.zeros((16,), jnp.float32), "var1": jnp.ones((16,), jnp.float32),
        "g2": jnp.ones((32,), jnp.float32), "beta2": jnp.zeros((32,), jnp.float32),
        "mu2": jnp.zeros((32,), jnp.float32), "var2": jnp.ones((32,), jnp.float32),
        # value head
        "wv1": u(ks[4], (hidden, lin_in), lin_in), "bv1": u(ks[5], (hidden,), lin_in),
        "wv2": u(ks[6], (nb_actions, hidden), hidden), "bv2": u(ks[7], (nb_actions,), hidden),
        # advantage head
        "wa1": u(ks[8], (hidden, lin_in), lin_in), "ba1": u(ks[9], (hidden,), lin_in),
        "wa2": u(ks[10], (nb_actions, hidden), hidden), "ba2": u(ks[11], (nb_actions,), hidden),
    }
    return p


# ------------------------------ reference ------------------------------------

def ref_forward(x, p):
    def conv(z, w, b, s):
        y = lax.conv_general_dilated(z, w, (s, s), "VALID",
                                     dimension_numbers=("NCHW", "OIHW", "NCHW"))
        return y + b[None, :, None, None]

    def bn(y, g, beta, mu, var):
        return ((y - mu[None, :, None, None])
                * lax.rsqrt(var[None, :, None, None] + BN_EPS)
                * g[None, :, None, None] + beta[None, :, None, None])

    lrelu = lambda y: jnp.where(y > 0, y, LEAK * y)

    y = lrelu(bn(conv(x, p["w1"], p["b1"], 2), p["g1"], p["beta1"], p["mu1"], p["var1"]))
    y = lrelu(bn(conv(y, p["w2"], p["b2"], 2), p["g2"], p["beta2"], p["mu2"], p["var2"]))
    B, C, H, W = y.shape
    ph, pw = H // 3, W // 3
    y = y[:, :, :ph * 3, :pw * 3].reshape(B, C, ph, 3, pw, 3).max(axis=(3, 5))
    feat = y.reshape(B, -1)

    def mlp(w1, b1, w2, b2):
        h = lrelu(feat @ w1.T + b1)
        return h @ w2.T + b2

    v = mlp(p["wv1"], p["bv1"], p["wv2"], p["bv2"])
    a = mlp(p["wa1"], p["ba1"], p["wa2"], p["ba2"])
    return v + (a - a.mean())


# --------------------------------- main ---------------------------------------

if __name__ == "__main__":
    # Small shapes consistent with the module: batch=2, channels=4, 36x36 frames
    # (36 is the smallest "nice" size that survives conv(5,2)->conv(5,2)->pool(3)
    # with a 2x2 pooled grid, exercising the full pooling/selection path).
    B, C, H, W = 2, 4, 36, 36
    hidden, nb_actions = 32, 6

    convw = conv2d_size_out(conv2d_size_out(conv2d_size_out(W)), 3, 3)
    convh = conv2d_size_out(conv2d_size_out(conv2d_size_out(H)), 3, 3)
    lin_in = convw * convh * 32          # = 128 for 36x36 input

    key = jax.random.PRNGKey(0)
    kx, kparam = jax.random.split(key)
    x = jax.random.normal(kx, (B, C, H, W), jnp.float32)
    params = init_params(kparam, C, hidden, nb_actions, lin_in)
    kernel_params = prepare_params(params, H, W)   # one-time weight lowering (bf16)

    q = jax.jit(dueling_dqn_forward)(x, kernel_params)
    q = jax.block_until_ready(q)

    q_ref = ref_forward(x, params)
    assert q.shape == (B, nb_actions), q.shape
    # bf16 weights/activations (f32 accumulation) vs the pure-f32 reference.
    assert jnp.allclose(q, q_ref, rtol=2e-2, atol=2e-2), (q, q_ref)

    print("KERNEL_OK")
</pallas_src>

<mosaic_0001>
module attributes {stable_mosaic.version = 11 : i64} {
  func.func @_fused_forward_kernel(%arg0: memref<32x720xbf16, #tpu.memory_space<vmem>>, %arg1: memref<720x256xbf16, #tpu.memory_space<vmem>>, %arg2: memref<1x256xf32, #tpu.memory_space<vmem>>, %arg3: memref<5x256x192xbf16, #tpu.memory_space<vmem>>, %arg4: memref<1x192xf32, #tpu.memory_space<vmem>>, %arg5: memref<2x128x64xbf16, #tpu.memory_space<vmem>>, %arg6: memref<1x64xf32, #tpu.memory_space<vmem>>, %arg7: memref<64x12xbf16, #tpu.memory_space<vmem>>, %arg8: memref<1x12xf32, #tpu.memory_space<vmem>>, %arg9: memref<2x6xf32, #tpu.memory_space<vmem>>) attributes {dimension_semantics = [], scalar_prefetch = 0 : i64, scratch_operands = 0 : i64, tpu.core_type = #tpu.core_type<tc>} {
    %c0 = arith.constant 0 : index
    %c0_0 = arith.constant 0 : index
    %0 = vector.load %arg0[%c0, %c0_0] : memref<32x720xbf16, #tpu.memory_space<vmem>>, vector<32x720xbf16>
    %c0_1 = arith.constant 0 : index
    %c0_2 = arith.constant 0 : index
    %1 = vector.load %arg1[%c0_1, %c0_2] : memref<720x256xbf16, #tpu.memory_space<vmem>>, vector<720x256xbf16>
    %cst = arith.constant dense<0.000000e+00> : vector<32x256xf32>
    %2 = tpu.matmul %0, %1, %cst {dimension_numbers = #tpu.dot_dimension_numbers<[1], [0], [0], [1], [0, 0, 1, 1], [], []>} : vector<32x720xbf16>, vector<720x256xbf16>, vector<32x256xf32> -> vector<32x256xf32>
    %c0_3 = arith.constant 0 : index
    %c0_4 = arith.constant 0 : index
    %3 = vector.load %arg2[%c0_3, %c0_4] : memref<1x256xf32, #tpu.memory_space<vmem>>, vector<1x256xf32>
    %4 = vector.broadcast %3 : vector<1x256xf32> to vector<32x256xf32>
    %5 = arith.addf %2, %4 : vector<32x256xf32>
    %cst_5 = arith.constant 0.000000e+00 : f32
    %6 = vector.broadcast %cst_5 : f32 to vector<32x256xf32>
    %7 = arith.cmpf ogt, %5, %6 : vector<32x256xf32>
    %cst_6 = arith.constant 0.00999999977 : f32
    %8 = vector.broadcast %cst_6 : f32 to vector<32x256xf32>
    %9 = arith.mulf %8, %5 : vector<32x256xf32>
    %10 = arith.select %7, %5, %9 : vector<32x256xi1>, vector<32x256xf32>
    %11 = arith.truncf %10 : vector<32x256xf32> to vector<32x256xbf16>
    %12 = vector.extract_strided_slice %11 {offsets = [0, 0], sizes = [12, 256], strides = [1, 1]} : vector<32x256xbf16> to vector<12x256xbf16>
    %c0_7 = arith.constant 0 : index
    %c0_8 = arith.constant 0 : index
    %c0_9 = arith.constant 0 : index
    %13 = vector.load %arg3[%c0_7, %c0_8, %c0_9] : memref<5x256x192xbf16, #tpu.memory_space<vmem>>, vector<1x256x192xbf16>
    %14 = vector.shape_cast %13 : vector<1x256x192xbf16> to vector<256x192xbf16>
    %cst_10 = arith.constant dense<0.000000e+00> : vector<12x192xf32>
    %15 = tpu.matmul %12, %14, %cst_10 {dimension_numbers = #tpu.dot_dimension_numbers<[1], [0], [0], [1], [0, 0, 1, 1], [], []>} : vector<12x256xbf16>, vector<256x192xbf16>, vector<12x192xf32> -> vector<12x192xf32>
    %16 = vector.extract_strided_slice %11 {offsets = [16, 0], sizes = [12, 256], strides = [1, 1]} : vector<32x256xbf16> to vector<12x256xbf16>
    %c1 = arith.constant 1 : index
    %c0_11 = arith.constant 0 : index
    %c0_12 = arith.constant 0 : index
    %17 = vector.load %arg3[%c1, %c0_11, %c0_12] : memref<5x256x192xbf16, #tpu.memory_space<vmem>>, vector<1x256x192xbf16>
    %18 = vector.shape_cast %17 : vector<1x256x192xbf16> to vector<256x192xbf16>
    %cst_13 = arith.constant dense<0.000000e+00> : vector<12x192xf32>
    %19 = tpu.matmul %16, %18, %cst_13 {dimension_numbers = #tpu.dot_dimension_numbers<[1], [0], [0], [1], [0, 0, 1, 1], [], []>} : vector<12x256xbf16>, vector<256x192xbf16>, vector<12x192xf32> -> vector<12x192xf32>
    %20 = arith.addf %15, %19 : vector<12x192xf32>
    %21 = vector.extract_strided_slice %11 {offsets = [2, 0], sizes = [12, 256], strides = [1, 1]} : vector<32x256xbf16> to vector<12x256xbf16>
    %c2 = arith.constant 2 : index
    %c0_14 = arith.constant 0 : index
    %c0_15 = arith.constant 0 : index
    %22 = vector.load %arg3[%c2, %c0_14, %c0_15] : memref<5x256x192xbf16, #tpu.memory_space<vmem>>, vector<1x256x192xbf16>
    %23 = vector.shape_cast %22 : vector<1x256x192xbf16> to vector<256x192xbf16>
    %cst_16 = arith.constant dense<0.000000e+00> : vector<12x192xf32>
    %24 = tpu.matmul %21, %23, %cst_16 {dimension_numbers = #tpu.dot_dimension_numbers<[1], [0], [0], [1], [0, 0, 1, 1], [], []>} : vector<12x256xbf16>, vector<256x192xbf16>, vector<12x192xf32> -> vector<12x192xf32>
    %25 = arith.addf %20, %24 : vector<12x192xf32>
    %26 = vector.extract_strided_slice %11 {offsets = [18, 0], sizes = [12, 256], strides = [1, 1]} : vector<32x256xbf16> to vector<12x256xbf16>
    %c3 = arith.constant 3 : index
    %c0_17 = arith.constant 0 : index
    %c0_18 = arith.constant 0 : index
    %27 = vector.load %arg3[%c3, %c0_17, %c0_18] : memref<5x256x192xbf16, #tpu.memory_space<vmem>>, vector<1x256x192xbf16>
    %28 = vector.shape_cast %27 : vector<1x256x192xbf16> to vector<256x192xbf16>
    %cst_19 = arith.constant dense<0.000000e+00> : vector<12x192xf32>
    %29 = tpu.matmul %26, %28, %cst_19 {dimension_numbers = #tpu.dot_dimension_numbers<[1], [0], [0], [1], [0, 0, 1, 1], [], []>} : vector<12x256xbf16>, vector<256x192xbf16>, vector<12x192xf32> -> vector<12x192xf32>
    %30 = arith.addf %25, %29 : vector<12x192xf32>
    %31 = vector.extract_strided_slice %11 {offsets = [4, 0], sizes = [12, 256], strides = [1, 1]} : vector<32x256xbf16> to vector<12x256xbf16>
    %c4 = arith.constant 4 : index
    %c0_20 = arith.constant 0 : index
    %c0_21 = arith.constant 0 : index
    %32 = vector.load %arg3[%c4, %c0_20, %c0_21] : memref<5x256x192xbf16, #tpu.memory_space<vmem>>, vector<1x256x192xbf16>
    %33 = vector.shape_cast %32 : vector<1x256x192xbf16> to vector<256x192xbf16>
    %cst_22 = arith.constant dense<0.000000e+00> : vector<12x192xf32>
    %34 = tpu.matmul %31, %33, %cst_22 {dimension_numbers = #tpu.dot_dimension_numbers<[1], [0], [0], [1], [0, 0, 1, 1], [], []>} : vector<12x256xbf16>, vector<256x192xbf16>, vector<12x192xf32> -> vector<12x192xf32>
    %35 = arith.addf %30, %34 : vector<12x192xf32>
    %c0_23 = arith.constant 0 : index
    %c0_24 = arith.constant 0 : index
    %36 = vector.load %arg4[%c0_23, %c0_24] : memref<1x192xf32, #tpu.memory_space<vmem>>, vector<1x192xf32>
    %37 = vector.broadcast %36 : vector<1x192xf32> to vector<12x192xf32>
    %38 = arith.addf %35, %37 : vector<12x192xf32>
    %cst_25 = arith.constant 0.000000e+00 : f32
    %39 = vector.broadcast %cst_25 : f32 to vector<12x192xf32>
    %40 = arith.cmpf ogt, %38, %39 : vector<12x192xf32>
    %cst_26 = arith.constant 0.00999999977 : f32
    %41 = vector.broadcast %cst_26 : f32 to vector<12x192xf32>
    %42 = arith.mulf %41, %38 : vector<12x192xf32>
    %43 = arith.select %40, %38, %42 : vector<12x192xi1>, vector<12x192xf32>
    %44 = vector.extract_strided_slice %43 {offsets = [0, 0], sizes = [2, 192], strides = [1, 1]} : vector<12x192xf32> to vector<2x192xf32>
    %45 = vector.extract_strided_slice %43 {offsets = [2, 0], sizes = [2, 192], strides = [1, 1]} : vector<12x192xf32> to vector<2x192xf32>
    %46 = arith.maximumf %44, %45 : vector<2x192xf32>
    %47 = vector.extract_strided_slice %43 {offsets = [4, 0], sizes = [2, 192], strides = [1, 1]} : vector<12x192xf32> to vector<2x192xf32>
    %48 = arith.maximumf %46, %47 : vector<2x192xf32>
    %49 = vector.extract_strided_slice %48 {offsets = [0, 0], sizes = [2, 128], strides = [1, 1]} : vector<2x192xf32> to vector<2x128xf32>
    %50 = vector.extract_strided_slice %48 {offsets = [0, 32], sizes = [2, 128], strides = [1, 1]} : vector<2x192xf32> to vector<2x128xf32>
    %51 = arith.maximumf %49, %50 : vector<2x128xf32>
    %52 = vector.extract_strided_slice %48 {offsets = [0, 64], sizes = [2, 128], strides = [1, 1]} : vector<2x192xf32> to vector<2x128xf32>
    %53 = arith.maximumf %51, %52 : vector<2x128xf32>
    %54 = arith.truncf %53 : vector<2x128xf32> to vector<2x128xbf16>
    %c0_27 = arith.constant 0 : index
    %c0_28 = arith.constant 0 : index
    %c0_29 = arith.constant 0 : index
    %55 = vector.load %arg5[%c0_27, %c0_28, %c0_29] : memref<2x128x64xbf16, #tpu.memory_space<vmem>>, vector<1x128x64xbf16>
    %56 = vector.shape_cast %55 : vector<1x128x64xbf16> to vector<128x64xbf16>
    %cst_30 = arith.constant dense<0.000000e+00> : vector<2x64xf32>
    %57 = tpu.matmul %54, %56, %cst_30 {dimension_numbers = #tpu.dot_dimension_numbers<[1], [0], [0], [1], [0, 0, 1, 1], [], []>} : vector<2x128xbf16>, vector<128x64xbf16>, vector<2x64xf32> -> vector<2x64xf32>
    %58 = vector.extract_strided_slice %43 {offsets = [6, 0], sizes = [2, 192], strides = [1, 1]} : vector<12x192xf32> to vector<2x192xf32>
    %59 = vector.extract_strided_slice %43 {offsets = [8, 0], sizes = [2, 192], strides = [1, 1]} : vector<12x192xf32> to vector<2x192xf32>
    %60 = arith.maximumf %58, %59 : vector<2x192xf32>
    %61 = vector.extract_strided_slice %43 {offsets = [10, 0], sizes = [2, 192], strides = [1, 1]} : vector<12x192xf32> to vector<2x192xf32>
    %62 = arith.maximumf %60, %61 : vector<2x192xf32>
    %63 = vector.extract_strided_slice %62 {offsets = [0, 0], sizes = [2, 128], strides = [1, 1]} : vector<2x192xf32> to vector<2x128xf32>
    %64 = vector.extract_strided_slice %62 {offsets = [0, 32], sizes = [2, 128], strides = [1, 1]} : vector<2x192xf32> to vector<2x128xf32>
    %65 = arith.maximumf %63, %64 : vector<2x128xf32>
    %66 = vector.extract_strided_slice %62 {offsets = [0, 64], sizes = [2, 128], strides = [1, 1]} : vector<2x192xf32> to vector<2x128xf32>
    %67 = arith.maximumf %65, %66 : vector<2x128xf32>
    %68 = arith.truncf %67 : vector<2x128xf32> to vector<2x128xbf16>
    %c1_31 = arith.constant 1 : index
    %c0_32 = arith.constant 0 : index
    %c0_33 = arith.constant 0 : index
    %69 = vector.load %arg5[%c1_31, %c0_32, %c0_33] : memref<2x128x64xbf16, #tpu.memory_space<vmem>>, vector<1x128x64xbf16>
    %70 = vector.shape_cast %69 : vector<1x128x64xbf16> to vector<128x64xbf16>
    %cst_34 = arith.constant dense<0.000000e+00> : vector<2x64xf32>
    %71 = tpu.matmul %68, %70, %cst_34 {dimension_numbers = #tpu.dot_dimension_numbers<[1], [0], [0], [1], [0, 0, 1, 1], [], []>} : vector<2x128xbf16>, vector<128x64xbf16>, vector<2x64xf32> -> vector<2x64xf32>
    %72 = arith.addf %57, %71 : vector<2x64xf32>
    %c0_35 = arith.constant 0 : index
    %c0_36 = arith.constant 0 : index
    %73 = vector.load %arg6[%c0_35, %c0_36] : memref<1x64xf32, #tpu.memory_space<vmem>>, vector<1x64xf32>
    %74 = vector.broadcast %73 : vector<1x64xf32> to vector<2x64xf32>
    %75 = arith.addf %72, %74 : vector<2x64xf32>
    %cst_37 = arith.constant 0.000000e+00 : f32
    %76 = vector.broadcast %cst_37 : f32 to vector<2x64xf32>
    %77 = arith.cmpf ogt, %75, %76 : vector<2x64xf32>
    %cst_38 = arith.constant 0.00999999977 : f32
    %78 = vector.broadcast %cst_38 : f32 to vector<2x64xf32>
    %79 = arith.mulf %78, %75 : vector<2x64xf32>
    %80 = arith.select %77, %75, %79 : vector<2x64xi1>, vector<2x64xf32>
    %81 = arith.truncf %80 : vector<2x64xf32> to vector<2x64xbf16>
    %c0_39 = arith.constant 0 : index
    %c0_40 = arith.constant 0 : index
    %82 = vector.load %arg7[%c0_39, %c0_40] : memref<64x12xbf16, #tpu.memory_space<vmem>>, vector<64x12xbf16>
    %cst_41 = arith.constant dense<0.000000e+00> : vector<2x12xf32>
    %83 = tpu.matmul %81, %82, %cst_41 {dimension_numbers = #tpu.dot_dimension_numbers<[1], [0], [0], [1], [0, 0, 1, 1], [], []>} : vector<2x64xbf16>, vector<64x12xbf16>, vector<2x12xf32> -> vector<2x12xf32>
    %c0_42 = arith.constant 0 : index
    %c0_43 = arith.constant 0 : index
    %84 = vector.load %arg8[%c0_42, %c0_43] : memref<1x12xf32, #tpu.memory_space<vmem>>, vector<1x12xf32>
    %85 = vector.broadcast %84 : vector<1x12xf32> to vector<2x12xf32>
    %86 = arith.addf %83, %85 : vector<2x12xf32>
    %87 = vector.extract_strided_slice %86 {offsets = [0, 0], sizes = [2, 6], strides = [1, 1]} : vector<2x12xf32> to vector<2x6xf32>
    %88 = vector.extract_strided_slice %86 {offsets = [0, 6], sizes = [2, 6], strides = [1, 1]} : vector<2x12xf32> to vector<2x6xf32>
    %89 = vector.shape_cast %88 : vector<2x6xf32> to vector<1x2x6xf32>
    %cst_44 = arith.constant dense<0.000000e+00> : vector<1xf32>
    %90 = vector.multi_reduction <add>, %89, %cst_44 [1, 2] : vector<1x2x6xf32> to vector<1xf32>
    %91 = vector.shape_cast %90 : vector<1xf32> to vector<1x1x1xf32>
    %92 = vector.extract %91[0, 0, 0] : f32 from vector<1x1x1xf32>
    %cst_45 = arith.constant 1.200000e+01 : f32
    %93 = arith.divf %92, %cst_45 : f32
    %94 = vector.broadcast %93 : f32 to vector<2x6xf32>
    %95 = arith.subf %88, %94 : vector<2x6xf32>
    %96 = arith.addf %87, %95 : vector<2x6xf32>
    %c0_46 = arith.constant 0 : index
    %c0_47 = arith.constant 0 : index
    %97 = vector.load %arg9[%c0_46, %c0_47] : memref<2x6xf32, #tpu.memory_space<vmem>>, vector<2x6xf32>
    tpu.vector_store %arg9[%c0_46, %c0_47], %96 {strides = array<i32>} : memref<2x6xf32, #tpu.memory_space<vmem>>, vector<2x6xf32>,
    return
  }
}

</mosaic_0001>

<bundles_post_ra>
// kernel: dueling_dqn_forward.1
= control target key start
LH: loop header
LB: loop body
LE: loop exit
PB: predicated region body
PF: predicated region fallthrough
CT: control target
= control target key end

     0   :  { %vm650_vm0 = vcmask 654336   ;;  %s6027_s0 = inlined_call_operand.vmem [shape: bf16[32,720], index: 0, kind: input, shape index: {}]   ;;  %s6028_s1 = inlined_call_operand.vmem [shape: bf16[720,256], index: 1, kind: input, shape index: {}]   ;;  %s6029_s2 = inlined_call_operand.vmem [shape: f32[1,256], index: 2, kind: input, shape index: {}]   ;;  %s6030_s3 = inlined_call_operand.vmem [shape: bf16[5,256,192], index: 3, kind: input, shape index: {}]   ;;  %s6031_s4 = inlined_call_operand.vmem [shape: f32[1,192], index: 4, kind: input, shape index: {}]   ;;  %s6032_s5 = inlined_call_operand.vmem [shape: bf16[2,128,64], index: 5, kind: input, shape index: {}]   ;;  %s6033_s6 = inlined_call_operand.vmem [shape: f32[1,64], index: 6, kind: input, shape index: {}]   ;;  %s6034_s7 = inlined_call_operand.vmem [shape: bf16[64,12], index: 7, kind: input, shape index: {}]   ;;  %s6035_s8 = inlined_call_operand.vmem [shape: f32[1,12], index: 8, kind: input, shape index: {}]   ;;  %s6036_s9 = inlined_call_operand.hbm [shape: f32[2,6], index: 9, kind: output, shape index: {}]  }
   0x1   :  { %v2660_v0 = vld [vmem:[%s6028_s1 + $0x70] sm:$0xf]  ;;  %v3858_v1 = vld [vmem:[%s6028_s1 + $0x74] sm:$0xf0]  ;;  %v2652_v11 = vld [vmem:[%s6028_s1 + $0x60] sm:$0xf] }
   0x2   :  { %v2724_v2 = vld [vmem:[%s6028_s1 + $0xf0] sm:$0xf]  ;;  %v2661_v3 = vor.u32 %v3858_v1, %v2660_v0  ;;  %v3874_v4 = vld [vmem:[%s6028_s1 + $0xf4] sm:$0xf0]  ;;  %v3856_v13 = vld [vmem:[%s6028_s1 + $0x64] sm:$0xf0] }
   0x3   :  { %v2788_v5 = vld [vmem:[%s6028_s1 + $0x170] sm:$0xf]  ;;  %v3890_v6 = vld [vmem:[%s6028_s1 + $0x174] sm:$0xf0]  ;;  %v2725_v7 = vor.u32 %v3874_v4, %v2724_v2  ;;  %v2716_v14 = vld [vmem:[%s6028_s1 + $0xe0] sm:$0xf]  ;;  %v2653_v16 = vor.u32 %v3856_v13, %v2652_v11 }
   0x4   :  { %v2789_v8 = vor.u32 %v3890_v6, %v2788_v5  ;;  %v2852_v9 = vld [vmem:[%s6028_s1 + $0x1f0] sm:$0xf]  ;;  %v3906_v10 = vld [vmem:[%s6028_s1 + $0x1f4] sm:$0xf0]  ;;  %657 = vmatpush.bf16.msra.mxu0 %v2661_v3  ;;  %v3872_v15 = vld [vmem:[%s6028_s1 + $0xe4] sm:$0xf0] }
   0x5   :  { %v2853_v12 = vor.u32 %v3906_v10, %v2852_v9  ;;  %676 = vmatpush.bf16.msra.mxu1 %v2725_v7  ;;  %v2717_v17 = vor.u32 %v3872_v15, %v2716_v14  ;;  %v2780_v18 = vld [vmem:[%s6028_s1 + $0x160] sm:$0xf]  ;;  %v3888_v19 = vld [vmem:[%s6028_s1 + $0x164] sm:$0xf0]  ;;  %v2644_v23 = vld [vmem:[%s6028_s1 + $0x50] sm:$0xf] }
   0x6   :  { %695 = vmatpush.bf16.msra.mxu2 %v2789_v8  ;;  %v2844_v20 = vld [vmem:[%s6028_s1 + $0x1e0] sm:$0xf]  ;;  %v2781_v21 = vor.u32 %v3888_v19, %v2780_v18  ;;  %v3904_v22 = vld [vmem:[%s6028_s1 + $0x1e4] sm:$0xf0]  ;;  %v3854_v24 = vld [vmem:[%s6028_s1 + $0x54] sm:$0xf0] }
   0x7   :  { %714 = vmatpush.bf16.msra.mxu3 %v2853_v12  ;;  %v2845_v25 = vor.u32 %v3904_v22, %v2844_v20  ;;  %v2708_v26 = vld [vmem:[%s6028_s1 + $0xd0] sm:$0xf]  ;;  %v3870_v27 = vld [vmem:[%s6028_s1 + $0xd4] sm:$0xf0]  ;;  %v2645_v29 = vor.u32 %v3854_v24, %v2644_v23  ;;  %v2636_v35 = vld [vmem:[%s6028_s1 + $0x40] sm:$0xf] }
   0x8   :  { %v2772_v28 = vld [vmem:[%s6028_s1 + $0x150] sm:$0xf]  ;;  %658 = vmatpush.bf16.msra.mxu0 %v2653_v16  ;;  %v3886_v30 = vld [vmem:[%s6028_s1 + $0x154] sm:$0xf0]  ;;  %v2709_v33 = vor.u32 %v3870_v27, %v2708_v26  ;;  %v3852_v36 = vld [vmem:[%s6028_s1 + $0x44] sm:$0xf0] }
   0x9   :  { %v2836_v31 = vld [vmem:[%s6028_s1 + $0x1d0] sm:$0xf]  ;;  %v3902_v32 = vld [vmem:[%s6028_s1 + $0x1d4] sm:$0xf0]  ;;  %677 = vmatpush.bf16.msra.mxu1 %v2717_v17  ;;  %v2773_v34 = vor.u32 %v3886_v30, %v2772_v28  ;;  %v2700_v37 = vld [vmem:[%s6028_s1 + $0xc0] sm:$0xf]  ;;  %v2637_v44 = vor.u32 %v3852_v36, %v2636_v35 }
   0xa   :  { %696 = vmatpush.bf16.msra.mxu2 %v2781_v21  ;;  %v2837_v38 = vor.u32 %v3902_v32, %v2836_v31  ;;  %v3868_v39 = vld [vmem:[%s6028_s1 + $0xc4] sm:$0xf0]  ;;  %v2764_v40 = vld [vmem:[%s6028_s1 + $0x140] sm:$0xf]  ;;  %v2628_v47 = vld [vmem:[%s6028_s1 + $0x30] sm:$0xf] }
   0xb   :  { %715 = vmatpush.bf16.msra.mxu3 %v2845_v25  ;;  %v3884_v41 = vld [vmem:[%s6028_s1 + $0x144] sm:$0xf0]  ;;  %v2828_v42 = vld [vmem:[%s6028_s1 + $0x1c0] sm:$0xf]  ;;  %v2701_v45 = vor.u32 %v3868_v39, %v2700_v37  ;;  %v3850_v48 = vld [vmem:[%s6028_s1 + $0x34] sm:$0xf0] }
   0xc   :  { %v3900_v43 = vld [vmem:[%s6028_s1 + $0x1c4] sm:$0xf0]  ;;  %659 = vmatpush.bf16.msra.mxu0 %v2645_v29  ;;  %v2765_v46 = vor.u32 %v3884_v41, %v2764_v40  ;;  %v2692_v49 = vld [vmem:[%s6028_s1 + $0xb0] sm:$0xf]  ;;  %v3866_v51 = vld [vmem:[%s6028_s1 + $0xb4] sm:$0xf0]  ;;  %v2629_v56 = vor.u32 %v3850_v48, %v2628_v47 }
   0xd   :  { %678 = vmatpush.bf16.msra.mxu1 %v2709_v33  ;;  %v2829_v50 = vor.u32 %v3900_v43, %v2828_v42  ;;  %v2756_v52 = vld [vmem:[%s6028_s1 + $0x130] sm:$0xf]  ;;  %v3882_v53 = vld [vmem:[%s6028_s1 + $0x134] sm:$0xf0]  ;;  %v2693_v57 = vor.u32 %v3866_v51, %v2692_v49  ;;  %v2620_v59 = vld [vmem:[%s6028_s1 + $0x20] sm:$0xf] }
   0xe   :  { %697 = vmatpush.bf16.msra.mxu2 %v2773_v34  ;;  %v2820_v54 = vld [vmem:[%s6028_s1 + $0x1b0] sm:$0xf]  ;;  %v3898_v55 = vld [vmem:[%s6028_s1 + $0x1b4] sm:$0xf0]  ;;  %v2757_v58 = vor.u32 %v3882_v53, %v2756_v52  ;;  %v3848_v60 = vld [vmem:[%s6028_s1 + $0x24] sm:$0xf0] }
   0xf   :  { %716 = vmatpush.bf16.msra.mxu3 %v2837_v38  ;;  %v2684_v61 = vld [vmem:[%s6028_s1 + $0xa0] sm:$0xf]  ;;  %v2821_v62 = vor.u32 %v3898_v55, %v2820_v54  ;;  %v3864_v63 = vld [vmem:[%s6028_s1 + $0xa4] sm:$0xf0]  ;;  %v2621_v4 = vor.u32 %v3848_v60, %v2620_v59  ;;  %v2612_v7 = vld [vmem:[%s6028_s1 + $0x10] sm:$0xf] }
  0x10   :  { %660 = vmatpush.bf16.msra.mxu0 %v2637_v44  ;;  %v2748_v0 = vld [vmem:[%s6028_s1 + $0x120] sm:$0xf]  ;;  %v3880_v1 = vld [vmem:[%s6028_s1 + $0x124] sm:$0xf0]  ;;  %v2685_v5 = vor.u32 %v3864_v63, %v2684_v61  ;;  %v3846_v8 = vld [vmem:[%s6028_s1 + $0x14] sm:$0xf0] }
  0x11   :  { %679 = vmatpush.bf16.msra.mxu1 %v2701_v45  ;;  %v2812_v2 = vld [vmem:[%s6028_s1 + $0x1a0] sm:$0xf]  ;;  %v3896_v3 = vld [vmem:[%s6028_s1 + $0x1a4] sm:$0xf0]  ;;  %v2749_v6 = vor.u32 %v3880_v1, %v2748_v0  ;;  %v2676_v9 = vld [vmem:[%s6028_s1 + $0x90] sm:$0xf]  ;;  %v2613_v17 = vor.u32 %v3846_v8, %v2612_v7 }
  0x12   :  { %698 = vmatpush.bf16.msra.mxu2 %v2765_v46  ;;  %v2813_v10 = vor.u32 %v3896_v3, %v2812_v2  ;;  %v3862_v11 = vld [vmem:[%s6028_s1 + $0x94] sm:$0xf0]  ;;  %v2740_v12 = vld [vmem:[%s6028_s1 + $0x110] sm:$0xf]  ;;  %v2604_v16 = vld [vmem:[%s6028_s1] sm:$0xf] }
  0x13   :  { %717 = vmatpush.bf16.msra.mxu3 %v2829_v50  ;;  %v3878_v13 = vld [vmem:[%s6028_s1 + $0x114] sm:$0xf0]  ;;  %v2804_v14 = vld [vmem:[%s6028_s1 + $0x190] sm:$0xf]  ;;  %v3844_v18 = vld [vmem:[%s6028_s1 + $0x4] sm:$0xf0]  ;;  %v2677_v21 = vor.u32 %v3862_v11, %v2676_v9 }
  0x14   :  { %661 = vmatpush.bf16.msra.mxu0 %v2629_v56  ;;  %v3894_v15 = vld [vmem:[%s6028_s1 + $0x194] sm:$0xf0]  ;;  %v2668_v19 = vld [vmem:[%s6028_s1 + $0x80] sm:$0xf]  ;;  %v3860_v20 = vld [vmem:[%s6028_s1 + $0x84] sm:$0xf0]  ;;  %v2741_v22 = vor.u32 %v3878_v13, %v2740_v12  ;;  %v2605_v33 = vor.u32 %v3844_v18, %v2604_v16 }
  0x15   :  { %680 = vmatpush.bf16.msra.mxu1 %v2693_v57  ;;  %v2732_v23 = vld [vmem:[%s6028_s1 + $0x100] sm:$0xf]  ;;  %v3876_v24 = vld [vmem:[%s6028_s1 + $0x104] sm:$0xf0]  ;;  %v2805_v26 = vor.u32 %v3894_v15, %v2804_v14  ;;  %v3834_v29 = vld [vmem:[%s6027_s0 + $0x14] sm:$0xf0]  ;;  %v2669_v37 = vor.u32 %v3860_v20, %v2668_v19 }
  0x16   :  { %699 = vmatpush.bf16.msra.mxu2 %v2757_v58  ;;  %v2796_v25 = vld [vmem:[%s6028_s1 + $0x180] sm:$0xf]  ;;  %v3892_v27 = vld [vmem:[%s6028_s1 + $0x184] sm:$0xf0]  ;;  %v3831_v30 = vld [vmem:[%s6027_s0 + $0x4] sm:$0xf]  ;;  %v2733_v38 = vor.u32 %v3876_v24, %v2732_v23 }
  0x17   :  { %718 = vmatpush.bf16.msra.mxu3 %v2821_v62  ;;  %v2556_v28 = vld [vmem:[%s6027_s0] sm:$0xf]  ;;  %v2916_v31 = vld [vmem:[%s6028_s1 + $0x270] sm:$0xf]  ;;  %v3922_v32 = vld [vmem:[%s6028_s1 + $0x274] sm:$0xf0]  ;;  %v2797_v42 = vor.u32 %v3892_v27, %v2796_v25 }
  0x18   :  { %662 = vmatpush.bf16.msra.mxu0 %v2621_v4  ;;  %v2558_v34 = vld [vmem:[%s6027_s0 + $0x18] sm:$0xf0]  ;;  %v3857_v35 = vld [vmem:[%s6028_s1 + $0x74] sm:$0xf]  ;;  %v2564_v39 = vld [vmem:[%s6027_s0 + $0x8] sm:$0xf]  ;;  %v2917_v44 = vor.u32 %v3922_v32, %v2916_v31  ;;  %v4461_v47 = vor.u32 %v3834_v29, %v2556_v28 }
  0x19   :  { %681 = vmatpush.bf16.msra.mxu1 %v2685_v5  ;;  %v2662_v36 = vld [vmem:[%s6028_s1 + $0x78] sm:$0xf0]  ;;  %v3835_v40 = vld [vmem:[%s6027_s0 + $0x1c] sm:$0xf0]  ;;  %v3832_v41 = vld [vmem:[%s6027_s0 + $0xc] sm:$0xf]  ;;  %v4472_v52 = vor.u32 %v3831_v30, %v2558_v34 }
  0x1a   :  { %700 = vmatpush.bf16.msra.mxu2 %v2749_v6  ;;  %v2566_v43 = vld [vmem:[%s6027_s0 + $0x20] sm:$0xf0]  ;;  %v3873_v45 = vld [vmem:[%s6028_s1 + $0xf4] sm:$0xf]  ;;  %v2726_v46 = vld [vmem:[%s6028_s1 + $0xf8] sm:$0xf0]  ;;  %v2665_v48 = vor.u32 %v3857_v35, %v2662_v36  ;;  %v4474_v53 = vor.u32 %v3835_v40, %v2564_v39 }
  0x1b   :  { %719 = vmatpush.bf16.msra.mxu3 %v2813_v10  ;;  %v2908_v49 = vld [vmem:[%s6028_s1 + $0x260] sm:$0xf]  ;;  %v3920_v50 = vld [vmem:[%s6028_s1 + $0x264] sm:$0xf0]  ;;  %v3855_v54 = vld [vmem:[%s6028_s1 + $0x64] sm:$0xf]  ;;  %v4485_v57 = vor.u32 %v3832_v41, %v2566_v43  ;;  %v2729_v59 = vor.u32 %v3873_v45, %v2726_v46 }
  0x1c   :  { %663 = vmatpush.bf16.msra.mxu0 %v2613_v17  ;;  %v2956_v51 = vld [vmem:[%s6028_s1 + $0x2c0] sm:$0xf]  ;;  %v2654_v55 = vld [vmem:[%s6028_s1 + $0x68] sm:$0xf0]  ;;  %v3932_v56 = vld [vmem:[%s6028_s1 + $0x2c4] sm:$0xf0]  ;;  %v2909_v60 = vor.u32 %v3920_v50, %v2908_v49 }
  0x1d   :  { %682 = vmatpush.bf16.msra.mxu1 %v2677_v21  ;;  %v2957_v58 = vor.u32 %v3932_v56, %v2956_v51  ;;  %v3871_v61 = vld [vmem:[%s6028_s1 + $0xe4] sm:$0xf]  ;;  %v2657_v62 = vor.u32 %v3855_v54, %v2654_v55  ;;  %v2718_v63 = vld [vmem:[%s6028_s1 + $0xe8] sm:$0xf0]  ;;  %v2900_v0 = vld [vmem:[%s6028_s1 + $0x250] sm:$0xf] }
  0x1e   :  { %701 = vmatpush.bf16.msra.mxu2 %v2741_v22  ;;  %v3918_v1 = vld [vmem:[%s6028_s1 + $0x254] sm:$0xf0]  ;;  %v3853_v2 = vld [vmem:[%s6028_s1 + $0x54] sm:$0xf]  ;;  %v2646_v3 = vld [vmem:[%s6028_s1 + $0x58] sm:$0xf0]  ;;  %v2721_v6 = vor.u32 %v3871_v61, %v2718_v63 }
  0x1f   :  { %720 = vmatpush.bf16.msra.mxu3 %v2805_v26  ;;  %v2948_v4 = vld [vmem:[%s6028_s1 + $0x2b0] sm:$0xf]  ;;  %v3930_v5 = vld [vmem:[%s6028_s1 + $0x2b4] sm:$0xf0]  ;;  %v2901_v7 = vor.u32 %v3918_v1, %v2900_v0  ;;  %v3869_v8 = vld [vmem:[%s6028_s1 + $0xd4] sm:$0xf]  ;;  %v2649_v11 = vor.u32 %v3853_v2, %v2646_v3 }
  0x20   :  { %664 = vmatpush.bf16.msra.mxu0 %v2605_v33  ;;  %v2710_v9 = vld [vmem:[%s6028_s1 + $0xd8] sm:$0xf0]  ;;  %v2949_v10 = vor.u32 %v3930_v5, %v2948_v4  ;;  %v2892_v12 = vld [vmem:[%s6028_s1 + $0x240] sm:$0xf]  ;;  %v3916_v13 = vld [vmem:[%s6028_s1 + $0x244] sm:$0xf0] }
  0x21   :  { %683 = vmatpush.bf16.msra.mxu1 %v2669_v37  ;;  %v2940_v14 = vld [vmem:[%s6028_s1 + $0x2a0] sm:$0xf]  ;;  %v3851_v15 = vld [vmem:[%s6028_s1 + $0x44] sm:$0xf]  ;;  %v2638_v16 = vld [vmem:[%s6028_s1 + $0x48] sm:$0xf0]  ;;  %v2713_v21 = vor.u32 %v3869_v8, %v2710_v9  ;;  %v2893_v22 = vor.u32 %v3916_v13, %v2892_v12 }
  0x22   :  { %702 = vmatpush.bf16.msra.mxu2 %v2733_v38  ;;  %v3928_v17 = vld [vmem:[%s6028_s1 + $0x2a4] sm:$0xf0]  ;;  %v3867_v18 = vld [vmem:[%s6028_s1 + $0xc4] sm:$0xf]  ;;  %v2702_v19 = vld [vmem:[%s6028_s1 + $0xc8] sm:$0xf0]  ;;  %v2641_v27 = vor.u32 %v3851_v15, %v2638_v16 }
  0x23   :  { %721 = vmatpush.bf16.msra.mxu3 %v2797_v42  ;;  %665 = vmatmul.bf16.vlgmr.msra.gmra.mxu0 %v4461_v47  ;;  %v2941_v20 = vor.u32 %v3928_v17, %v2940_v14  ;;  %v2580_v23 = vld [vmem:[%s6027_s0 + $0x30] sm:$0xf]  ;;  %v3840_v24 = vld [vmem:[%s6027_s0 + $0x44] sm:$0xf0]  ;;  %v3926_v26 = vld [vmem:[%s6028_s1 + $0x294] sm:$0xf0]  ;;  %v2705_v39 = vor.u32 %v3867_v18, %v2702_v19 }
  0x24   :  { %733 = vmatpush.bf16.msrb.mxu0 %v2917_v44  ;;  %684 = vmatmul.bf16.vlgmr.msra.gmra.mxu1 %v4472_v52  ;;  %v2932_v25 = vld [vmem:[%s6028_s1 + $0x290] sm:$0xf]  ;;  %v3837_v28 = vld [vmem:[%s6027_s0 + $0x34] sm:$0xf]  ;;  %v2582_v29 = vld [vmem:[%s6027_s0 + $0x48] sm:$0xf0]  ;;  %v4596_v44 = vor.u32 %v3840_v24, %v2580_v23 }
  0x25   :  { %703 = vmatmul.bf16.vlgmr.msra.gmra.mxu2 %v4474_v53  ;;  %755 = vmatpush.bf16.msrb.mxu1 %v2957_v58  ;;  %v2884_v30 = vld [vmem:[%s6028_s1 + $0x230] sm:$0xf]  ;;  %v3914_v31 = vld [vmem:[%s6028_s1 + $0x234] sm:$0xf0]  ;;  %v3849_v33 = vld [vmem:[%s6028_s1 + $0x34] sm:$0xf]  ;;  %v2933_v38 = vor.u32 %v3926_v26, %v2932_v25  ;;  %v4607_v50 = vor.u32 %v3837_v28, %v2582_v29 }
  0x26   :  { %771 = vmatpush.bf16.msrb.mxu2 %v2665_v48  ;;  %722 = vmatmul.bf16.vlgmr.msra.gmra.mxu3 %v4485_v57  ;;  %v2588_v32 = vld [vmem:[%s6027_s0 + $0x38] sm:$0xf]  ;;  %v2630_v34 = vld [vmem:[%s6028_s1 + $0x38] sm:$0xf0]  ;;  %v3841_v35 = vld [vmem:[%s6027_s0 + $0x4c] sm:$0xf0]  ;;  %v2885_v40 = vor.u32 %v3914_v31, %v2884_v30 }
  0x27   :  { %790 = vmatpush.bf16.msrb.mxu3 %v2729_v59  ;;  %v3838_v36 = vld [vmem:[%s6027_s0 + $0x3c] sm:$0xf]  ;;  %v2590_v37 = vld [vmem:[%s6027_s0 + $0x50] sm:$0xf0]  ;;  %v2924_v42 = vld [vmem:[%s6028_s1 + $0x280] sm:$0xf]  ;;  %v2633_v45 = vor.u32 %v3849_v33, %v2630_v34  ;;  %v4609_v51 = vor.u32 %v3841_v35, %v2588_v32 }
  0x28   :  { %734 = vmatpush.bf16.msrb.mxu0 %v2909_v60  ;;  %v3865_v41 = vld [vmem:[%s6028_s1 + $0xb4] sm:$0xf]  ;;  %v3924_v43 = vld [vmem:[%s6028_s1 + $0x284] sm:$0xf0]  ;;  %v2694_v46 = vld [vmem:[%s6028_s1 + $0xb8] sm:$0xf0]  ;;  %v4617_v56 = vor.u32 %v3838_v36, %v2590_v37 }
  0x29   :  { %756 = vmatpush.bf16.msrb.mxu1 %v2949_v10  ;;  %v2876_v48 = vld [vmem:[%s6028_s1 + $0x220] sm:$0xf]  ;;  %v3912_v49 = vld [vmem:[%s6028_s1 + $0x224] sm:$0xf0]  ;;  %v3847_v54 = vld [vmem:[%s6028_s1 + $0x24] sm:$0xf]  ;;  %v2925_v58 = vor.u32 %v3924_v43, %v2924_v42  ;;  %v2697_v61 = vor.u32 %v3865_v41, %v2694_v46 }
  0x2a   :  { %772 = vmatpush.bf16.msrb.mxu2 %v2657_v62  ;;  %v2622_v55 = vld [vmem:[%s6028_s1 + $0x28] sm:$0xf0]  ;;  %v3905_v59 = vld [vmem:[%s6028_s1 + $0x1f4] sm:$0xf]  ;;  %v2854_v60 = vld [vmem:[%s6028_s1 + $0x1f8] sm:$0xf0]  ;;  %v2877_v62 = vor.u32 %v3912_v49, %v2876_v48 }
  0x2b   :  { %791 = vmatpush.bf16.msrb.mxu3 %v2721_v6  ;;  %v3863_v63 = vld [vmem:[%s6028_s1 + $0xa4] sm:$0xf]  ;;  %v2686_v0 = vld [vmem:[%s6028_s1 + $0xa8] sm:$0xf0]  ;;  %v2625_v1 = vor.u32 %v3847_v54, %v2622_v55  ;;  %v2868_v2 = vld [vmem:[%s6028_s1 + $0x210] sm:$0xf]  ;;  %v2857_v5 = vor.u32 %v3905_v59, %v2854_v60 }
  0x2c   :  { %735 = vmatpush.bf16.msrb.mxu0 %v2901_v7  ;;  %v3910_v3 = vld [vmem:[%s6028_s1 + $0x214] sm:$0xf0]  ;;  %v3845_v4 = vld [vmem:[%s6028_s1 + $0x14] sm:$0xf]  ;;  %v2614_v6 = vld [vmem:[%s6028_s1 + $0x18] sm:$0xf0]  ;;  %v2689_v9 = vor.u32 %v3863_v63, %v2686_v0 }
  0x2d   :  { %757 = vmatpush.bf16.msrb.mxu1 %v2941_v20  ;;  %v3903_v7 = vld [vmem:[%s6028_s1 + $0x1e4] sm:$0xf]  ;;  %v2846_v8 = vld [vmem:[%s6028_s1 + $0x1e8] sm:$0xf0]  ;;  %v2869_v10 = vor.u32 %v3910_v3, %v2868_v2  ;;  %v2678_v12 = vld [vmem:[%s6028_s1 + $0x98] sm:$0xf0]  ;;  %v2617_v14 = vor.u32 %v3845_v4, %v2614_v6 }
  0x2e   :  { %773 = vmatpush.bf16.msrb.mxu2 %v2649_v11  ;;  %v3861_v11 = vld [vmem:[%s6028_s1 + $0x94] sm:$0xf]  ;;  %v2860_v13 = vld [vmem:[%s6028_s1 + $0x200] sm:$0xf]  ;;  %v3908_v15 = vld [vmem:[%s6028_s1 + $0x204] sm:$0xf0]  ;;  %v2849_v18 = vor.u32 %v3903_v7, %v2846_v8 }
  0x2f   :  { %792 = vmatpush.bf16.msrb.mxu3 %v2713_v21  ;;  %v3843_v16 = vld [vmem:[%s6028_s1 + $0x4] sm:$0xf]  ;;  %v2606_v17 = vld [vmem:[%s6028_s1 + $0x8] sm:$0xf0]  ;;  %v3889_v19 = vld [vmem:[%s6028_s1 + $0x174] sm:$0xf]  ;;  %v2681_v25 = vor.u32 %v3861_v11, %v2678_v12  ;;  %v2861_v26 = vor.u32 %v3908_v15, %v2860_v13 }
  0x30   :  { %736 = vmatpush.bf16.msrb.mxu0 %v2893_v22  ;;  %v2790_v20 = vld [vmem:[%s6028_s1 + $0x178] sm:$0xf0]  ;;  %v3921_v21 = vld [vmem:[%s6028_s1 + $0x274] sm:$0xf]  ;;  %v3859_v28 = vld [vmem:[%s6028_s1 + $0x84] sm:$0xf] }
  0x31   :  { %758 = vmatpush.bf16.msrb.mxu1 %v2933_v38  ;;  %v2918_v22 = vld [vmem:[%s6028_s1 + $0x278] sm:$0xf0]  ;;  %v3901_v23 = vld [vmem:[%s6028_s1 + $0x1d4] sm:$0xf]  ;;  %v2670_v29 = vld [vmem:[%s6028_s1 + $0x88] sm:$0xf0]  ;;  %v2793_v31 = vor.u32 %v3889_v19, %v2790_v20 }
  0x32   :  { %774 = vmatpush.bf16.msrb.mxu2 %v2641_v27  ;;  %v2838_v24 = vld [vmem:[%s6028_s1 + $0x1d8] sm:$0xf0]  ;;  %v2609_v27 = vor.u32 %v3843_v16, %v2606_v17  ;;  %v2572_v30 = vld [vmem:[%s6027_s0 + $0x10] sm:$0xf]  ;;  %v3836_v32 = vld [vmem:[%s6027_s0 + $0x24] sm:$0xf0]  ;;  %v2921_v33 = vor.u32 %v3921_v21, %v2918_v22 }
  0x33   :  { %793 = vmatpush.bf16.msrb.mxu3 %v2705_v39  ;;  %670 = vmatmul.bf16.gmra.mxu0 %v4596_v44  ;;  %v2841_v34 = vor.u32 %v3901_v23, %v2838_v24  ;;  %v3931_v35 = vld [vmem:[%s6028_s1 + $0x2c4] sm:$0xf]  ;;  %v2958_v36 = vld [vmem:[%s6028_s1 + $0x2c8] sm:$0xf0]  ;;  %v3833_v37 = vld [vmem:[%s6027_s0 + $0x14] sm:$0xf]  ;;  %v2673_v39 = vor.u32 %v3859_v28, %v2670_v29  ;;  %v4722_v43 = vor.u32 %v3836_v32, %v2572_v30 }
  0x34   :  { %737 = vmatpush.bf16.msrb.mxu0 %v2885_v40  ;;  %689 = vmatmul.bf16.gmra.mxu1 %v4607_v50  ;;  %v2574_v38 = vld [vmem:[%s6027_s0 + $0x28] sm:$0xf0]  ;;  %v3887_v40 = vld [vmem:[%s6028_s1 + $0x164] sm:$0xf]  ;;  %v2961_v49 = vor.u32 %v3931_v35, %v2958_v36  ;;  %v3929_v55 = vld [vmem:[%s6028_s1 + $0x2b4] sm:$0xf] }
  0x35   :  { %708 = vmatmul.bf16.gmra.mxu2 %v4609_v51  ;;  %759 = vmatpush.bf16.msrb.mxu1 %v2925_v58  ;;  %v2782_v41 = vld [vmem:[%s6028_s1 + $0x168] sm:$0xf0]  ;;  %v3919_v42 = vld [vmem:[%s6028_s1 + $0x264] sm:$0xf]  ;;  %v4733_v54 = vor.u32 %v3833_v37, %v2574_v38  ;;  %v2950_v58 = vld [vmem:[%s6028_s1 + $0x2b8] sm:$0xf0] }
  0x36   :  { %775 = vmatpush.bf16.msrb.mxu2 %v2633_v45  ;;  %727 = vmatmul.bf16.gmra.mxu3 %v4617_v56  ;;  %v2910_v45 = vld [vmem:[%s6028_s1 + $0x268] sm:$0xf0]  ;;  %v3899_v46 = vld [vmem:[%s6028_s1 + $0x1c4] sm:$0xf]  ;;  %v2785_v59 = vor.u32 %v3887_v40, %v2782_v41  ;;  %v3917_v63 = vld [vmem:[%s6028_s1 + $0x254] sm:$0xf]  ;;  %v2953_v4 = vor.u32 %v3929_v55, %v2950_v58 }
  0x37   :  { %794 = vmatpush.bf16.msrb.mxu3 %v2697_v61  ;;  %v2830_v48 = vld [vmem:[%s6028_s1 + $0x1c8] sm:$0xf0]  ;;  %v2913_v60 = vor.u32 %v3919_v42, %v2910_v45  ;;  %v3885_v61 = vld [vmem:[%s6028_s1 + $0x154] sm:$0xf]  ;;  %v2822_v3 = vld [vmem:[%s6028_s1 + $0x1b8] sm:$0xf0] }
  0x38   :  { %738 = vmatpush.bf16.msrb.mxu0 %v2877_v62  ;;  %v2774_v62 = vld [vmem:[%s6028_s1 + $0x158] sm:$0xf0]  ;;  %v2833_v0 = vor.u32 %v3899_v46, %v2830_v48  ;;  %v3897_v2 = vld [vmem:[%s6028_s1 + $0x1b4] sm:$0xf]  ;;  %v2942_v6 = vld [vmem:[%s6028_s1 + $0x2a8] sm:$0xf0] }
  0x39   :  { %828 = vmatpush.bf16.msra.mxu1 %v2857_v5  ;;  %v3927_v5 = vld [vmem:[%s6028_s1 + $0x2a4] sm:$0xf]  ;;  %v2777_v7 = vor.u32 %v3885_v61, %v2774_v62  ;;  %v2825_v11 = vor.u32 %v3897_v2, %v2822_v3 }
  0x3a   :  { %776 = vmatpush.bf16.msrb.mxu2 %v2625_v1  ;;  %v2902_v1 = vld [vmem:[%s6028_s1 + $0x258] sm:$0xf0]  ;;  %v3883_v8 = vld [vmem:[%s6028_s1 + $0x144] sm:$0xf] }
  0x3b   :  { %795 = vmatpush.bf16.msrb.mxu3 %v2689_v9  ;;  %v2905_v9 = vor.u32 %v3917_v63, %v2902_v1 }
  0x3c   :  { %739 = vmatpush.bf16.msrb.mxu0 %v2869_v10  ;;  %v3915_v10 = vld [vmem:[%s6028_s1 + $0x244] sm:$0xf] }
  0x3d   :  { %829 = vmatpush.bf16.msra.mxu1 %v2849_v18 }
  0x3e   :  { %777 = vmatpush.bf16.msrb.mxu2 %v2617_v14 }
  0x3f   :  { %796 = vmatpush.bf16.msrb.mxu3 %v2681_v25 }
  0x40   :  { %740 = vmatpush.bf16.msrb.mxu0 %v2861_v26 }
  0x41   :  { %830 = vmatpush.bf16.msra.mxu1 %v2841_v34 }
  0x42   :  { %778 = vmatpush.bf16.msrb.mxu2 %v2609_v27 }
  0x43   :  { %797 = vmatpush.bf16.msrb.mxu3 %v2673_v39  ;;  %741 = vmatmul.bf16.vlgmr.msrb.gmra.mxu0 %v4722_v43 }
  0x44   :  { %809 = vmatpush.bf16.msra.mxu0 %v2793_v31  ;;  %2962 = vmatmul.msk.bf16.vlgmr.msrb.gmra.mxu1 %vm650_vm0, %v4733_v54 }
  0x45   :  { %779 = vmatmul.bf16.vlgmr.msrb.gmra.mxu2 %v4461_v47  ;;  %v2766_v47 = vld [vmem:[%s6028_s1 + $0x148] sm:$0xf0]  ;;  %831 = vmatpush.bf16.msra.mxu1 %v2833_v0 }
  0x46   :  { %847 = vmatpush.bf16.msra.mxu2 %v2921_v33  ;;  %798 = vmatmul.bf16.vlgmr.msrb.gmra.mxu3 %v4472_v52 }
  0x47   :  { %869 = vmatpush.bf16.msra.mxu3 %v2961_v49 }
  0x48   :  { %810 = vmatpush.bf16.msra.mxu0 %v2785_v59 }
  0x4a   :  { %848 = vmatpush.bf16.msra.mxu2 %v2913_v60 }
  0x4b   :  { %14 = vsyncpa [#allocation3], 0  ;;  %v2894_v52 = vld [vmem:[%s6028_s1 + $0x248] sm:$0xf0]  ;;  %870 = vmatpush.bf16.msra.mxu3 %v2953_v4  ;;  %v3895_v12 = vld [vmem:[%s6028_s1 + $0x1a4] sm:$0xf]  ;;  %v2945_v14 = vor.u32 %v3927_v5, %v2942_v6  ;;  %v2769_v17 = vor.u32 %v3883_v8, %v2766_v47  ;;  %832 = vmatpush.bf16.msra.mxu1 %v2825_v11 }
  0x4c   :  { %v2814_v13 = vld [vmem:[%s6028_s1 + $0x1a8] sm:$0xf0]  ;;  %v3925_v15 = vld [vmem:[%s6028_s1 + $0x294] sm:$0xf]  ;;  %v2934_v16 = vld [vmem:[%s6028_s1 + $0x298] sm:$0xf0]  ;;  %811 = vmatpush.bf16.msra.mxu0 %v2777_v7  ;;  %v2897_v18 = vor.u32 %v3915_v10, %v2894_v52 }
  0x4d   :  { %v2596_v19 = vld [vmem:[%s6027_s0 + $0x40] sm:$0xf]  ;;  %v3881_v20 = vld [vmem:[%s6028_s1 + $0x134] sm:$0xf]  ;;  %v2758_v21 = vld [vmem:[%s6028_s1 + $0x138] sm:$0xf0]  ;;  %v2817_v23 = vor.u32 %v3895_v12, %v2814_v13  ;;  %v2937_v27 = vor.u32 %v3925_v15, %v2934_v16 }
  0x4e   :  { %849 = vmatpush.bf16.msra.mxu2 %v2905_v9  ;;  %v3913_v22 = vld [vmem:[%s6028_s1 + $0x234] sm:$0xf]  ;;  %v2886_v24 = vld [vmem:[%s6028_s1 + $0x238] sm:$0xf0]  ;;  %v3842_v28 = vld [vmem:[%s6027_s0 + $0x54] sm:$0xf0]  ;;  %v2761_v33 = vor.u32 %v3881_v20, %v2758_v21 }
  0x4f   :  { %871 = vmatpush.bf16.msra.mxu3 %v2945_v14  ;;  %v3893_v25 = vld [vmem:[%s6028_s1 + $0x194] sm:$0xf]  ;;  %v2806_v26 = vld [vmem:[%s6028_s1 + $0x198] sm:$0xf0]  ;;  %v3923_v29 = vld [vmem:[%s6028_s1 + $0x284] sm:$0xf]  ;;  %v2889_v34 = vor.u32 %v3913_v22, %v2886_v24  ;;  %833 = vmatpush.bf16.msra.mxu1 %v2817_v23  ;;  %v2597_v39 = vor.u32 %v3842_v28, %v2596_v19 }
  0x50   :  { %v2926_v30 = vld [vmem:[%s6028_s1 + $0x288] sm:$0xf0]  ;;  %812 = vmatpush.bf16.msra.mxu0 %v2769_v17  ;;  %v3839_v31 = vld [vmem:[%s6027_s0 + $0x44] sm:$0xf]  ;;  %v2598_v32 = vld [vmem:[%s6027_s0 + $0x58] sm:$0xf0]  ;;  %v2809_v38 = vor.u32 %v3893_v25, %v2806_v26 }
  0x51   :  { %v3879_v35 = vld [vmem:[%s6028_s1 + $0x124] sm:$0xf]  ;;  %v2750_v36 = vld [vmem:[%s6028_s1 + $0x128] sm:$0xf0]  ;;  %v2929_v45 = vor.u32 %v3923_v29, %v2926_v30  ;;  %v2601_v46 = vor.u32 %v3839_v31, %v2598_v32  ;;  %v3877_v55 = vld [vmem:[%s6028_s1 + $0x114] sm:$0xf] }
  0x52   :  { %850 = vmatpush.bf16.msra.mxu2 %v2897_v18  ;;  %v3911_v37 = vld [vmem:[%s6028_s1 + $0x224] sm:$0xf]  ;;  %v2878_v40 = vld [vmem:[%s6028_s1 + $0x228] sm:$0xf0]  ;;  %v2753_v48 = vor.u32 %v3879_v35, %v2750_v36  ;;  %v2742_v58 = vld [vmem:[%s6028_s1 + $0x118] sm:$0xf0] }
  0x53   :  { %872 = vmatpush.bf16.msra.mxu3 %v2937_v27  ;;  %v3891_v41 = vld [vmem:[%s6028_s1 + $0x184] sm:$0xf]  ;;  %v2798_v42 = vld [vmem:[%s6028_s1 + $0x188] sm:$0xf0]  ;;  %v2881_v49 = vor.u32 %v3911_v37, %v2878_v40  ;;  %834 = vmatpush.bf16.msra.mxu1 %v2809_v38  ;;  %v3909_v60 = vld [vmem:[%s6028_s1 + $0x214] sm:$0xf]  ;;  %v2745_v62 = vor.u32 %v3877_v55, %v2742_v58 }
  0x54   :  { %813 = vmatpush.bf16.msra.mxu0 %v2761_v33  ;;  %v2801_v59 = vor.u32 %v3891_v41, %v2798_v42  ;;  %v2870_v61 = vld [vmem:[%s6028_s1 + $0x218] sm:$0xf0]  ;;  %2963 = vmatmul.msk.bf16.gmra.mxu1 %vm650_vm0, %v2601_v46  ;;  %v3875_v0 = vld [vmem:[%s6028_s1 + $0x104] sm:$0xf]  ;;  %v2734_v1 = vld [vmem:[%s6028_s1 + $0x108] sm:$0xf0] }
  0x55   :  { %746 = vmatmul.bf16.gmra.mxu0 %v2597_v39  ;;  %784 = vmatmul.bf16.gmra.mxu2 %v4596_v44  ;;  %v2873_v63 = vor.u32 %v3909_v60, %v2870_v61  ;;  %v3907_v2 = vld [vmem:[%s6028_s1 + $0x204] sm:$0xf]  ;;  %v2862_v44 = vld [vmem:[%s6028_s1 + $0x208] sm:$0xf0]  ;;  %v4886_v4 = vld [vmem:[%s6029_s2] sm:$0x3] }
  0x56   :  { %851 = vmatpush.bf16.msra.mxu2 %v2889_v34  ;;  %803 = vmatmul.bf16.gmra.mxu3 %v4607_v50  ;;  %v2737_v50 = vor.u32 %v3875_v0, %v2734_v1  ;;  %v2865_v3 = vor.u32 %v3907_v2, %v2862_v44  ;;  %v3056_v16 = vld [vmem:[%s6030_s3 + $0x170] sm:$0xf]  ;;  %v3980_v17 = vld [vmem:[%s6030_s3 + $0x174] sm:$0xf0]  ;;  %v3979_v22 = vld [vmem:[%s6030_s3 + $0x174] sm:$0xf] }
  0x57   :  { %873 = vmatpush.bf16.msra.mxu3 %v2929_v45  ;;  %835 = vmatpush.bf16.msra.mxu1 %v2801_v59  ;;  %v3120_v18 = vld [vmem:[%s6030_s3 + $0x1f0] sm:$0xf]  ;;  %v3057_v20 = vor.u32 %v3980_v17, %v3056_v16  ;;  %v3996_v21 = vld [vmem:[%s6030_s3 + $0x1f4] sm:$0xf0]  ;;  %v3058_v23 = vld [vmem:[%s6030_s3 + $0x178] sm:$0xf0] }
  0x58   :  { %814 = vmatpush.bf16.msra.mxu0 %v2753_v48  ;;  %v3121_v25 = vor.u32 %v3996_v21, %v3120_v18  ;;  %v3061_v26 = vor.u32 %v3979_v22, %v3058_v23  ;;  %v3995_v27 = vld [vmem:[%s6030_s3 + $0x1f4] sm:$0xf]  ;;  %v3122_v28 = vld [vmem:[%s6030_s3 + $0x1f8] sm:$0xf0]  ;;  %v3048_v30 = vld [vmem:[%s6030_s3 + $0x160] sm:$0xf] }
  0x59   :  { %v3125_v29 = vor.u32 %v3995_v27, %v3122_v28  ;;  %v3978_v31 = vld [vmem:[%s6030_s3 + $0x164] sm:$0xf0]  ;;  %v3112_v32 = vld [vmem:[%s6030_s3 + $0x1e0] sm:$0xf]  ;;  %v3977_v35 = vld [vmem:[%s6030_s3 + $0x164] sm:$0xf] }
  0x5a   :  { %852 = vmatpush.bf16.msra.mxu2 %v2881_v49  ;;  %v3049_v33 = vor.u32 %v3978_v31, %v3048_v30  ;;  %v3994_v34 = vld [vmem:[%s6030_s3 + $0x1e4] sm:$0xf0]  ;;  %v3050_v36 = vld [vmem:[%s6030_s3 + $0x168] sm:$0xf0]  ;;  %v3993_v40 = vld [vmem:[%s6030_s3 + $0x1e4] sm:$0xf] }
  0x5b   :  { %1162 = vmatpush.bf16.msrb.mxu1 %v3121_v25  ;;  %1190 = vmatpush.bf16.msrb.mxu3 %v3125_v29  ;;  %v3113_v38 = vor.u32 %v3994_v34, %v3112_v32  ;;  %v3114_v41 = vld [vmem:[%s6030_s3 + $0x1e8] sm:$0xf0]  ;;  %v3040_v55 = vld [vmem:[%s6030_s3 + $0x150] sm:$0xf]  ;;  %v3976_v58 = vld [vmem:[%s6030_s3 + $0x154] sm:$0xf0] }
  0x5c   :  { %815 = vmatpush.bf16.msra.mxu0 %v2745_v62  ;;  %v3117_v48 = vor.u32 %v3993_v40, %v3114_v41  ;;  %v3104_v59 = vld [vmem:[%s6030_s3 + $0x1d0] sm:$0xf]  ;;  %v3041_v61 = vor.u32 %v3976_v58, %v3040_v55  ;;  %v3992_v62 = vld [vmem:[%s6030_s3 + $0x1d4] sm:$0xf0]  ;;  %v3042_v0 = vld [vmem:[%s6030_s3 + $0x158] sm:$0xf0] }
  0x5d   :  { %v3105_v1 = vor.u32 %v3992_v62, %v3104_v59  ;;  %v3991_v44 = vld [vmem:[%s6030_s3 + $0x1d4] sm:$0xf]  ;;  %v3024_v16 = vld [vmem:[%s6030_s3 + $0x130] sm:$0xf]  ;;  %v3972_v17 = vld [vmem:[%s6030_s3 + $0x134] sm:$0xf0] }
  0x5e   :  { %853 = vmatpush.bf16.msra.mxu2 %v2873_v63  ;;  %v3975_v63 = vld [vmem:[%s6030_s3 + $0x154] sm:$0xf]  ;;  %v3088_v18 = vld [vmem:[%s6030_s3 + $0x1b0] sm:$0xf]  ;;  %v3026_v22 = vld [vmem:[%s6030_s3 + $0x138] sm:$0xf0] }
  0x5f   :  { %1163 = vmatpush.bf16.msrb.mxu1 %v3113_v38  ;;  %1191 = vmatpush.bf16.msrb.mxu3 %v3117_v48  ;;  %v3045_v2 = vor.u32 %v3975_v63, %v3042_v0  ;;  %v3971_v21 = vld [vmem:[%s6030_s3 + $0x134] sm:$0xf]  ;;  %v3090_v27 = vld [vmem:[%s6030_s3 + $0x1b8] sm:$0xf0]  ;;  %v5032_v28 = vperm.slane %v4886_v4, 1  ;;  %s4172_s26 = smov 64  }
  0x60   :  { %816 = vmatpush.bf16.msra.mxu0 %v2737_v50  ;;  %v3106_v50 = vld [vmem:[%s6030_s3 + $0x1d8] sm:$0xf0]  ;;  %v3029_v25 = vor.u32 %v3971_v21, %v3026_v22  ;;  %v3016_v30 = vld [vmem:[%s6030_s3 + $0x120] sm:$0xf]  ;;  %v3970_v31 = vld [vmem:[%s6030_s3 + $0x124] sm:$0xf0] }
  0x61   :  { %v3080_v32 = vld [vmem:[%s6030_s3 + $0x1a0] sm:$0xf]  ;;  %v3017_v34 = vor.u32 %v3970_v31, %v3016_v30  ;;  %v3985_v38 = vld [vmem:[%s6030_s3 + $0x1a4] sm:$0xf]  ;;  %v3008_v59 = vld [vmem:[%s6030_s3 + $0x110] sm:$0xf] }
  0x62   :  { %854 = vmatpush.bf16.msra.mxu2 %v2865_v3  ;;  %v3109_v3 = vor.u32 %v3991_v44, %v3106_v50  ;;  %v3072_v62 = vld [vmem:[%s6030_s3 + $0x190] sm:$0xf]  ;;  %v3984_v0 = vld [vmem:[%s6030_s3 + $0x194] sm:$0xf0]  ;;  %v3963_v30 = vld [vmem:[%s6030_s3 + $0xf4] sm:$0xf] }
  0x63   :  { %1164 = vmatpush.bf16.msrb.mxu1 %v3105_v1  ;;  %v3967_v1 = vld [vmem:[%s6030_s3 + $0x114] sm:$0xf]  ;;  %v3073_v50 = vor.u32 %v3984_v0, %v3072_v62  ;;  %v3250_v31 = vld [vmem:[%s6030_s3 + $0xf8] sm:$0xf0]  ;;  %v3232_v62 = vld [vmem:[%s6030_s3 + $0xd0] sm:$0xf] }
  0x64   :  { %836 = vmatmul.bf16.vlgmr.msra.gmra.mxu1 %v4485_v57  ;;  %1148 = vmatpush.bf16.msrb.mxu0 %v3057_v20  ;;  %v3025_v20 = vor.u32 %v3972_v17, %v3024_v16  ;;  %v3066_v17 = vld [vmem:[%s6030_s3 + $0x188] sm:$0xf0]  ;;  %v3943_v0 = vld [vmem:[%s6030_s3 + $0x54] sm:$0xf]  ;;  %s4173_s27 = smov 96   ;;  %vm2243_vm13 = vcmask 785408  }
  0x65   :  { %817 = vmatmul.bf16.vlgmr.msra.gmra.mxu0 %v4474_v53  ;;  %855 = vmatmul.bf16.vlgmr.msra.gmra.mxu2 %v4722_v43  ;;  %v4889_v53 = vperm.slane %v4886_v4, 0  ;;  %v3986_v4 = vld [vmem:[%s6030_s3 + $0x1a4] sm:$0xf0]  ;;  %vm2251_vm14 = vcmask 523264   ;;  %s4176_s28 = smov [#allocation2]  }
  0x66   :  { %2964 = vmatmul.msk.bf16.vlgmr.msra.gmra.mxu3 %vm650_vm0, %v4733_v54  ;;  %1176 = vmatpush.bf16.msrb.mxu2 %v3061_v26  ;;  %v3987_v26 = vld [vmem:[%s6030_s3 + $0x1b4] sm:$0xf]  ;;  %s2543_s29 = sshll.u32 %s4176_s28, 4  ;;  %s2544_s29 = int_to_ptr.vmem [resolvable:$true] %s2543_s29 }
  0x67   :  { %1192 = vmatpush.bf16.msrb.mxu3 %v3109_v3  ;;  %v3093_v29 = vor.u32 %v3987_v26, %v3090_v27  ;;  %v3947_v26 = vld [vmem:[%s6030_s3 + $0x74] sm:$0xf] }
  0x68   :  { %1149 = vmatpush.bf16.msrb.mxu0 %v3049_v33 }
  0x6c   :  { %1150 = vmatpush.bf16.msrb.mxu0 %v3041_v61  ;;  %v3968_v61 = vld [vmem:[%s6030_s3 + $0x114] sm:$0xf0] }
  0x74   :  { %841 = vmatmul.bf16.gmra.mxu1 %v4617_v56 }
  0x75   :  { %822 = vmatmul.bf16.gmra.mxu0 %v4609_v51  ;;  %860 = vmatmul.bf16.gmra.mxu2 %v2597_v39  ;;  %v3053_v39 = vor.u32 %v3977_v35, %v3050_v36  ;;  %v3081_v35 = vor.u32 %v3986_v4, %v3080_v32  ;;  %v3969_v36 = vld [vmem:[%s6030_s3 + $0x124] sm:$0xf]  ;;  %v3253_v4 = vor.u32 %v3963_v30, %v3250_v31  ;;  %v3939_v30 = vld [vmem:[%s6030_s3 + $0x34] sm:$0xf]  ;;  %v3154_v31 = vld [vmem:[%s6030_s3 + $0x38] sm:$0xf0] }
  0x76   :  { %2965 = vmatmul.msk.bf16.gmra.mxu3 %vm650_vm0, %v2601_v46  ;;  %vm2510_vm0 = vcmask 41984  }
  0x77   :  { %1177 = vmatpush.bf16.msrb.mxu2 %v3053_v39 }
  0x7b   :  { %1178 = vmatpush.bf16.msrb.mxu2 %v3045_v2  ;;  %v3010_v2 = vld [vmem:[%s6030_s3 + $0x118] sm:$0xf0] }
  0x7c   :  { %v3013_v3 = vor.u32 %v3967_v1, %v3010_v2 }
  0xa0   :  { %v666_v57 = vpop.f32.mrf.mxu0 }
  0xa1   :  { %v667_v43 = vadd.f32 %v666_v57, %v4889_v53  ;;  %v685_v5 = vpop.f32.mrf.mxu1  ;;  %v3032_v57 = vld [vmem:[%s6030_s3 + $0x140] sm:$0xf] }
  0xa3   :  { %v686_v54 = vadd.f32 %v685_v5, %v667_v43  ;;  %v3974_v43 = vld [vmem:[%s6030_s3 + $0x144] sm:$0xf0]  ;;  %v3096_v5 = vld [vmem:[%s6030_s3 + $0x1c0] sm:$0xf] }
  0xa8   :  { %v704_v6 = vpop.f32.mrf.mxu2  ;;  %v668_v56 = vpop.f32.mrf.mxu0 }
  0xa9   :  { %v705_v51 = vadd.f32 %v704_v6, %v686_v54  ;;  %v723_v7 = vpop.f32.mrf.mxu3  ;;  %v669_v8 = vadd.f32 %v668_v56, %v4889_v53  ;;  %v687_v9 = vpop.f32.mrf.mxu1  ;;  %v3033_v54 = vor.u32 %v3974_v43, %v3032_v57  ;;  %v3990_v6 = vld [vmem:[%s6030_s3 + $0x1c4] sm:$0xf0]  ;;  %v3983_v57 = vld [vmem:[%s6030_s3 + $0x194] sm:$0xf]  ;;  %v3074_v43 = vld [vmem:[%s6030_s3 + $0x198] sm:$0xf0] }
  0xab   :  { %v4893_v47 = vadd.f32 %v723_v7, %v705_v51  ;;  %v688_v10 = vadd.f32 %v687_v9, %v669_v8  ;;  %v3973_v51 = vld [vmem:[%s6030_s3 + $0x144] sm:$0xf]  ;;  %v3034_v7 = vld [vmem:[%s6030_s3 + $0x148] sm:$0xf0]  ;;  %v3097_v8 = vor.u32 %v3990_v6, %v3096_v5  ;;  %1151 = vmatpush.bf16.msrb.mxu0 %v3033_v54  ;;  %v3077_v5 = vor.u32 %v3983_v57, %v3074_v43  ;;  %v3000_v54 = vld [vmem:[%s6030_s3 + $0x100] sm:$0xf] }
  0xac   :  { %v3037_v9 = vor.u32 %v3973_v51, %v3034_v7  ;;  %v3966_v6 = vld [vmem:[%s6030_s3 + $0x104] sm:$0xf0]  ;;  %v3064_v51 = vld [vmem:[%s6030_s3 + $0x180] sm:$0xf]  ;;  %v3959_v57 = vld [vmem:[%s6030_s3 + $0xd4] sm:$0xf] }
  0xad   :  { %1165 = vmatpush.bf16.msrb.mxu1 %v3097_v8  ;;  %v3982_v7 = vld [vmem:[%s6030_s3 + $0x184] sm:$0xf0]  ;;  %v3234_v43 = vld [vmem:[%s6030_s3 + $0xd8] sm:$0xf0] }
  0xae   :  { %1179 = vmatpush.bf16.msrb.mxu2 %v3037_v9  ;;  %v3001_v9 = vor.u32 %v3966_v6, %v3000_v54  ;;  %v3237_v6 = vor.u32 %v3959_v57, %v3234_v43  ;;  %v3136_v57 = vld [vmem:[%s6030_s3 + $0x10] sm:$0xf] }
  0xaf   :  { %1152 = vmatpush.bf16.msrb.mxu0 %v3025_v20  ;;  %v3948_v20 = vld [vmem:[%s6030_s3 + $0x74] sm:$0xf0]  ;;  %v3200_v43 = vld [vmem:[%s6030_s3 + $0x90] sm:$0xf] }
  0xb0   :  { %v706_v11 = vpop.f32.mrf.mxu2  ;;  %v671_v13 = vpop.f32.mrf.mxu0 }
  0xb1   :  { %v707_v52 = vadd.f32 %v706_v11, %v688_v10  ;;  %v725_v12 = vpop.f32.mrf.mxu3  ;;  %v672_v14 = vadd.f32 %v671_v13, %v4889_v53  ;;  %v690_v15 = vpop.f32.mrf.mxu1  ;;  %v3989_v10 = vld [vmem:[%s6030_s3 + $0x1c4] sm:$0xf]  ;;  %v3098_v11 = vld [vmem:[%s6030_s3 + $0x1c8] sm:$0xf0] }
  0xb2   :  { %v3101_v13 = vor.u32 %v3989_v10, %v3098_v11  ;;  %1180 = vmatpush.bf16.msrb.mxu2 %v3029_v25  ;;  %v3065_v10 = vor.u32 %v3982_v7, %v3064_v51  ;;  %v3965_v11 = vld [vmem:[%s6030_s3 + $0x104] sm:$0xf]  ;;  %v3964_v25 = vld [vmem:[%s6030_s3 + $0xf4] sm:$0xf0]  ;;  %v3160_v51 = vld [vmem:[%s6030_s3 + $0x40] sm:$0xf] }
  0xb3   :  { %v4905_v19 = vadd.f32 %v725_v12, %v707_v52  ;;  %v691_v24 = vadd.f32 %v690_v15, %v672_v14  ;;  %1153 = vmatpush.bf16.msrb.mxu0 %v3017_v34  ;;  %v3946_v34 = vld [vmem:[%s6030_s3 + $0x64] sm:$0xf0] }
  0xb4   :  { %1193 = vmatpush.bf16.msrb.mxu3 %v3101_v13  ;;  %v3981_v13 = vld [vmem:[%s6030_s3 + $0x184] sm:$0xf]  ;;  %v3942_v7 = vld [vmem:[%s6030_s3 + $0x44] sm:$0xf0] }
  0xb5   :  { %v3069_v21 = vor.u32 %v3981_v13, %v3066_v17  ;;  %v3162_v13 = vld [vmem:[%s6030_s3 + $0x48] sm:$0xf0]  ;;  %v3957_v17 = vld [vmem:[%s6030_s3 + $0xc4] sm:$0xf] }
  0xb8   :  { %v709_v37 = vpop.f32.mrf.mxu2  ;;  %v4946_v46 = vpop.f32.mrf.mxu0  ;;  %1194 = vmatpush.bf16.msrb.mxu3 %v3093_v29  ;;  %v3186_v29 = vld [vmem:[%s6030_s3 + $0x78] sm:$0xf0] }
  0xb9   :  { %v710_v42 = vadd.f32 %v709_v37, %v691_v24  ;;  %v728_v45 = vpop.f32.mrf.mxu3  ;;  %v4948_v49 = vpop.f32.mrf.mxu1  ;;  %v3018_v37 = vld [vmem:[%s6030_s3 + $0x128] sm:$0xf0]  ;;  %v3189_v32 = vor.u32 %v3947_v26, %v3186_v29  ;;  %v3956_v29 = vld [vmem:[%s6030_s3 + $0xb4] sm:$0xf0] }
  0xbb   :  { %v4959_v60 = vadd.f32 %v728_v45, %v710_v42  ;;  %v3021_v42 = vor.u32 %v3969_v36, %v3018_v37  ;;  %v3082_v45 = vld [vmem:[%s6030_s3 + $0x1a8] sm:$0xf0]  ;;  %v3962_v37 = vld [vmem:[%s6030_s3 + $0xe4] sm:$0xf0] }
  0xbc   :  { %v3085_v58 = vor.u32 %v3985_v38, %v3082_v45  ;;  %v3945_v38 = vld [vmem:[%s6030_s3 + $0x64] sm:$0xf]  ;;  %v3242_v45 = vld [vmem:[%s6030_s3 + $0xe8] sm:$0xf0] }
  0xbd   :  { %1181 = vmatpush.bf16.msrb.mxu2 %v3021_v42  ;;  %v3961_v42 = vld [vmem:[%s6030_s3 + $0xe4] sm:$0xf] }
  0xbe   :  { %1195 = vmatpush.bf16.msrb.mxu3 %v3085_v58 }
  0xc0   :  { %v4994_v56 = vpop.f32.mrf.mxu2  ;;  %v742_v12 = vpop.f32.mrf.mxu0 }
  0xc1   :  { %v5002_v52 = vpop.f32.mrf.mxu3  ;;  %v743_v14 = vadd.f32 %v742_v12, %v4893_v47  ;;  %v761_v15 = vpop.f32.mrf.mxu1  ;;  %v3988_v47 = vld [vmem:[%s6030_s3 + $0x1b4] sm:$0xf0]  ;;  %1182 = vmatpush.bf16.msrb.mxu2 %v3013_v3  ;;  %v3002_v12 = vld [vmem:[%s6030_s3 + $0x108] sm:$0xf0]  ;;  %v3170_v3 = vld [vmem:[%s6030_s3 + $0x58] sm:$0xf0] }
  0xc2   :  { %v3089_v24 = vor.u32 %v3988_v47, %v3088_v18  ;;  %1196 = vmatpush.bf16.msrb.mxu3 %v3077_v5  ;;  %v3005_v16 = vor.u32 %v3965_v11, %v3002_v12  ;;  %v3184_v18 = vld [vmem:[%s6030_s3 + $0x70] sm:$0xf]  ;;  %v3173_v54 = vor.u32 %v3943_v0, %v3170_v3  ;;  %v3958_v11 = vld [vmem:[%s6030_s3 + $0xc4] sm:$0xf0]  ;;  %v3941_v12 = vld [vmem:[%s6030_s3 + $0x44] sm:$0xf] }
  0xc3   :  { %v5023_v23 = vadd.f32 %v761_v15, %v743_v14  ;;  %v3185_v22 = vor.u32 %v3948_v20, %v3184_v18  ;;  %v3226_v18 = vld [vmem:[%s6030_s3 + $0xc8] sm:$0xf0]  ;;  %v3165_v20 = vor.u32 %v3941_v12, %v3162_v13 }
  0xc4   :  { %1166 = vmatpush.bf16.msrb.mxu1 %v3089_v24  ;;  %v3248_v24 = vld [vmem:[%s6030_s3 + $0xf0] sm:$0xf] }
  0xc5   :  { %1183 = vmatpush.bf16.msrb.mxu2 %v3005_v16  ;;  %v3249_v27 = vor.u32 %v3964_v25, %v3248_v24  ;;  %v3940_v24 = vld [vmem:[%s6030_s3 + $0x34] sm:$0xf0]  ;;  %v3216_v25 = vld [vmem:[%s6030_s3 + $0xb0] sm:$0xf]  ;;  %vm885_vm1 = vcmp.gt.f32.partialorder %v5023_v23, 0.0 }
  0xc6   :  { %1197 = vmatpush.bf16.msrb.mxu3 %v3069_v21  ;;  %v3229_v21 = vor.u32 %v3957_v17, %v3226_v18  ;;  %v3951_v18 = vld [vmem:[%s6030_s3 + $0x94] sm:$0xf] }
  0xc8   :  { %v780_v33 = vpop.f32.mrf.mxu2  ;;  %v744_v41 = vpop.f32.mrf.mxu0  ;;  %1167 = vmatpush.bf16.msrb.mxu1 %v3081_v35  ;;  %v3240_v35 = vld [vmem:[%s6030_s3 + $0xe0] sm:$0xf] }
  0xc9   :  { %v781_v39 = vadd.f32 %v780_v33, %v5032_v28  ;;  %v799_v40 = vpop.f32.mrf.mxu3  ;;  %v745_v48 = vadd.f32 %v744_v41, %v4905_v19  ;;  %v763_v55 = vpop.f32.mrf.mxu1  ;;  %v3009_v19 = vor.u32 %v3968_v61, %v3008_v59  ;;  %v3176_v33 = vld [vmem:[%s6030_s3 + $0x60] sm:$0xf]  ;;  %1402 = vmatpush.bf16.msra.mxu2 %v3189_v32  ;;  %v3245_v59 = vor.u32 %v3961_v42, %v3242_v45 }
  0xca   :  { %v3177_v36 = vor.u32 %v3946_v34, %v3176_v33  ;;  %1416 = vmatpush.bf16.msra.mxu3 %v3253_v4  ;;  %v3217_v33 = vor.u32 %v3956_v29, %v3216_v25  ;;  %v3955_v34 = vld [vmem:[%s6030_s3 + $0xb4] sm:$0xf]  ;;  %v3208_v42 = vld [vmem:[%s6030_s3 + $0xa0] sm:$0xf]  ;;  %v3934_v25 = vld [vmem:[%s6030_s3 + $0x4] sm:$0xf0] }
  0xcb   :  { %v5069_v63 = vadd.f32 %v799_v40, %v781_v39  ;;  %v5080_v44 = vadd.f32 %v763_v55, %v745_v48  ;;  %1154 = vmatpush.bf16.msrb.mxu0 %v3009_v19  ;;  %v3178_v39 = vld [vmem:[%s6030_s3 + $0x68] sm:$0xf0]  ;;  %v3241_v40 = vor.u32 %v3962_v37, %v3240_v35  ;;  %v3168_v48 = vld [vmem:[%s6030_s3 + $0x50] sm:$0xf]  ;;  %v3944_v55 = vld [vmem:[%s6030_s3 + $0x54] sm:$0xf0]  ;;  %v3157_v37 = vor.u32 %v3939_v30, %v3154_v31 }
  0xcc   :  { %1168 = vmatpush.bf16.msrb.mxu1 %v3073_v50  ;;  %v3181_v41 = vor.u32 %v3945_v38, %v3178_v39  ;;  %v3169_v61 = vor.u32 %v3944_v55, %v3168_v48  ;;  %v3960_v19 = vld [vmem:[%s6030_s3 + $0xd4] sm:$0xf0]  ;;  %v3218_v35 = vld [vmem:[%s6030_s3 + $0xb8] sm:$0xf0]  ;;  %v3954_v48 = vld [vmem:[%s6030_s3 + $0xa4] sm:$0xf0] }
  0xcd   :  { %v3233_v50 = vor.u32 %v3960_v19, %v3232_v62  ;;  %v3221_v38 = vor.u32 %v3955_v34, %v3218_v35  ;;  %v3146_v55 = vld [vmem:[%s6030_s3 + $0x28] sm:$0xf0]  ;;  %v3953_v62 = vld [vmem:[%s6030_s3 + $0xa4] sm:$0xf]  ;;  %v3950_v31 = vld [vmem:[%s6030_s3 + $0x84] sm:$0xf0] }
  0xce   :  { %1403 = vmatpush.bf16.msra.mxu2 %v3181_v41  ;;  %1417 = vmatpush.bf16.msra.mxu3 %v3245_v59  ;;  %v3938_v41 = vld [vmem:[%s6030_s3 + $0x24] sm:$0xf0]  ;;  %v3210_v19 = vld [vmem:[%s6030_s3 + $0xa8] sm:$0xf0]  ;;  %v3949_v35 = vld [vmem:[%s6030_s3 + $0x84] sm:$0xf] }
  0xcf   :  { %1155 = vmatpush.bf16.msrb.mxu0 %v3001_v9  ;;  %v3224_v9 = vld [vmem:[%s6030_s3 + $0xc0] sm:$0xf]  ;;  %vm887_vm3 = vcmp.gt.f32.partialorder %v5080_v44, 0.0 }
  0xd0   :  { %v5100_v8 = vpop.f32.mrf.mxu2  ;;  %1169 = vmatpush.bf16.msrb.mxu1 %v3065_v10  ;;  %v3161_v10 = vor.u32 %v3942_v7, %v3160_v51  ;;  %v3225_v16 = vor.u32 %v3958_v11, %v3224_v9  ;;  %v3952_v51 = vld [vmem:[%s6030_s3 + $0x94] sm:$0xf0]  ;;  %v3935_v7 = vld [vmem:[%s6030_s3 + $0x14] sm:$0xf]  ;;  %v3138_v9 = vld [vmem:[%s6030_s3 + $0x18] sm:$0xf0] }
  0xd1   :  { %v5111_v14 = vpop.f32.mrf.mxu3  ;;  %v5124_v47 = vpop.f32.mrf.mxu1  ;;  %v783_v59 = vadd.f32 %v5100_v8, %v5032_v28  ;;  %v3936_v8 = vld [vmem:[%s6030_s3 + $0x14] sm:$0xf0]  ;;  %v3201_v17 = vor.u32 %v3952_v51, %v3200_v43 }
  0xd2   :  { %v5113_v15 = vpop.f32.mrf.mxu0  ;;  %1404 = vmatpush.bf16.msra.mxu2 %v3173_v54  ;;  %1418 = vmatpush.bf16.msra.mxu3 %v3237_v6  ;;  %v3137_v6 = vor.u32 %v3936_v8, %v3136_v57 }
  0xd3   :  { %1374 = vmatpush.bf16.msra.mxu0 %v3185_v22  ;;  %v3152_v22 = vld [vmem:[%s6030_s3 + $0x30] sm:$0xf]  ;;  %v802_v11 = vadd.f32 %v5111_v14, %v783_v59  ;;  %v3128_v14 = vld [vmem:[%s6030_s3] sm:$0xf] }
  0xd4   :  { %1388 = vmatpush.bf16.msra.mxu1 %v3249_v27  ;;  %v3153_v27 = vor.u32 %v3940_v24, %v3152_v22  ;;  %v3141_v22 = vor.u32 %v3935_v7, %v3138_v9  ;;  %v3129_v34 = vor.u32 %v3934_v25, %v3128_v14  ;;  %v748_v7 = vadd.f32 %v5113_v15, %v4959_v60 }
  0xd6   :  { %1405 = vmatpush.bf16.msra.mxu2 %v3165_v20  ;;  %1419 = vmatpush.bf16.msra.mxu3 %v3229_v21  ;;  %v3202_v20 = vld [vmem:[%s6030_s3 + $0x98] sm:$0xf0] }
  0xd7   :  { %1375 = vmatpush.bf16.msra.mxu0 %v3177_v36  ;;  %v3205_v24 = vor.u32 %v3951_v18, %v3202_v20 }
  0xd8   :  { %v5174_v58 = vpop.f32.mrf.mxu2  ;;  %1389 = vmatpush.bf16.msra.mxu1 %v3241_v40  ;;  %v3144_v40 = vld [vmem:[%s6030_s3 + $0x20] sm:$0xf] }
  0xd9   :  { %v5185_v1 = vpop.f32.mrf.mxu3  ;;  %v5198_v5 = vpop.f32.mrf.mxu1  ;;  %v3145_v45 = vor.u32 %v3938_v41, %v3144_v40 }
  0xda   :  { %v5187_v2 = vpop.f32.mrf.mxu0  ;;  %1406 = vmatpush.bf16.msra.mxu2 %v3157_v37  ;;  %1420 = vmatpush.bf16.msra.mxu3 %v3221_v38  ;;  %v786_v37 = vadd.f32 %v5174_v58, %v5032_v28 }
  0xdb   :  { %1376 = vmatpush.bf16.msra.mxu0 %v3169_v61  ;;  %v3209_v61 = vor.u32 %v3954_v48, %v3208_v42  ;;  %v674_v42 = vadd.f32 %v4946_v46, %v4889_v53 }
  0xdc   :  { %1390 = vmatpush.bf16.msra.mxu1 %v3233_v50  ;;  %v3213_v50 = vor.u32 %v3953_v62, %v3210_v19  ;;  %v805_v58 = vadd.f32 %v5185_v1, %v786_v37  ;;  %v4028_v37 = vld [vmem:[%s6030_s3 + $0x2f4] sm:$0xf0] }
  0xde   :  { %1421 = vmatpush.bf16.msra.mxu3 %v3213_v50  ;;  %v895_v50 = vmul.f32 0.01, %v5080_v44 }
  0xdf   :  { %1377 = vmatpush.bf16.msra.mxu0 %v3161_v10  ;;  %v893_v10 = vmul.f32 0.01, %v5023_v23 }
  0xe0   :  { %v5233_v26 = vpop.f32.mrf.mxu2  ;;  %1391 = vmatpush.bf16.msra.mxu1 %v3225_v16  ;;  %v903_v8 = vsel %vm887_vm3, %v5080_v44, %v895_v50 }
  0xe1   :  { %v5244_v32 = vpop.f32.mrf.mxu3  ;;  %v837_v36 = vpop.f32.mrf.mxu1  ;;  %v788_v1 = vadd.f32 %v5233_v26, %v5032_v28 }
  0xe2   :  { %v818_v4 = vpop.f32.mrf.mxu0  ;;  %1422 = vmatpush.bf16.msra.mxu3 %v3205_v24 }
  0xe3   :  { %v819_v39 = vadd.f32 %v818_v4, %v5069_v63  ;;  %1378 = vmatpush.bf16.msra.mxu0 %v3153_v27  ;;  %v3937_v63 = vld [vmem:[%s6030_s3 + $0x24] sm:$0xf]  ;;  %v3192_v27 = vld [vmem:[%s6030_s3 + $0x80] sm:$0xf]  ;;  %v807_v9 = vadd.f32 %v5244_v32, %v788_v1 }
  0xe4   :  { %1392 = vmatpush.bf16.msra.mxu1 %v3217_v33  ;;  %v3149_v0 = vor.u32 %v3937_v63, %v3146_v55  ;;  %v3933_v4 = vld [vmem:[%s6030_s3 + $0x4] sm:$0xf]  ;;  %v3130_v33 = vld [vmem:[%s6030_s3 + $0x8] sm:$0xf0] }
  0xe5   :  { %v838_v3 = vadd.f32 %v837_v36, %v819_v39  ;;  %v3194_v36 = vld [vmem:[%s6030_s3 + $0x88] sm:$0xf0]  ;;  %v3193_v39 = vor.u32 %v3950_v31, %v3192_v27  ;;  %v3133_v40 = vor.u32 %v3933_v4, %v3130_v33  ;;  %v4025_v1 = vld [vmem:[%s6030_s3 + $0x2e4] sm:$0xf] }
  0xe6   :  { %1407 = vmatpush.bf16.msra.mxu2 %v3149_v0  ;;  %v3197_v41 = vor.u32 %v3949_v35, %v3194_v36  ;;  %v693_v0 = vadd.f32 %v4948_v49, %v674_v42  ;;  %v4012_v35 = vld [vmem:[%s6030_s3 + $0x274] sm:$0xf0]  ;;  %v3408_v36 = vld [vmem:[%s6030_s3 + $0x2f0] sm:$0xf] }
  0xe7   :  { %1379 = vmatpush.bf16.msra.mxu0 %v3145_v45  ;;  %v901_v45 = vsel %vm885_vm1, %v5023_v23, %v893_v10 }
  0xe8   :  { %v856_v54 = vpop.f32.mrf.mxu2  ;;  %1393 = vmatpush.bf16.msra.mxu1 %v3209_v61  ;;  %1423 = vmatpush.bf16.msra.mxu3 %v3197_v41 }
  0xe9   :  { %v857_v12 = vadd.f32 %v856_v54, %v838_v3  ;;  %v875_v13 = vpop.f32.mrf.mxu3  ;;  %v839_v21 = vpop.f32.mrf.mxu1  ;;  %v712_v3 = vadd.f32 %v4994_v56, %v693_v0 }
  0xea   :  { %v820_v16 = vpop.f32.mrf.mxu0  ;;  %1408 = vmatpush.bf16.msra.mxu2 %v3141_v22 }
  0xeb   :  { %v876_v29 = vadd.f32 %v875_v13, %v857_v12  ;;  %v821_v30 = vadd.f32 %v820_v16, %v802_v11  ;;  %1380 = vmatpush.bf16.msra.mxu0 %v3137_v6  ;;  %v731_v51 = vadd.f32 %v5002_v52, %v712_v3  ;;  %v767_v52 = vadd.f32 %v5124_v47, %v748_v7  ;;  %v3338_v3 = vld [vmem:[%s6030_s3 + $0x268] sm:$0xf0]  ;;  %v3392_v7 = vld [vmem:[%s6030_s3 + $0x2d0] sm:$0xf] }
  0xec   :  { %1394 = vmatpush.bf16.msra.mxu1 %v3201_v17 }
  0xed   :  { %vm886_vm2 = vcmp.gt.f32.partialorder %v876_v29, 0.0  ;;  %v894_v38 = vmul.f32 0.01, %v876_v29  ;;  %v840_v63 = vadd.f32 %v839_v21, %v821_v30  ;;  %v750_v13 = vadd.f32 %v5187_v2, %v731_v51 }
  0xee   :  { %1409 = vmatpush.bf16.msra.mxu2 %v3133_v40  ;;  %v897_v24 = vmul.f32 0.01, %v767_v52  ;;  %vm889_vm6 = vcmp.gt.f32.partialorder %v767_v52, 0.0 }
  0xef   :  { %v902_v48 = vsel %vm886_vm2, %v876_v29, %v894_v38  ;;  %1381 = vmatpush.bf16.msra.mxu0 %v3129_v34  ;;  %v769_v15 = vadd.f32 %v5198_v5, %v750_v13  ;;  %v3344_v5 = vld [vmem:[%s6030_s3 + $0x270] sm:$0xf]  ;;  %v4011_v38 = vld [vmem:[%s6030_s3 + $0x274] sm:$0xf]  ;;  %v3320_v13 = vld [vmem:[%s6030_s3 + $0x240] sm:$0xf] }
  0xf0   :  { %v909_v55 = vpack.c.bf16 %v902_v48, %v901_v45  ;;  %v858_v59 = vpop.f32.mrf.mxu2  ;;  %1395 = vmatpush.bf16.msra.mxu1 %v3193_v39  ;;  %v905_v30 = vsel %vm889_vm6, %v767_v52, %v897_v24  ;;  %v3346_v45 = vld [vmem:[%s6030_s3 + $0x278] sm:$0xf0]  ;;  %v4027_v48 = vld [vmem:[%s6030_s3 + $0x2f4] sm:$0xf]  ;;  %v3384_v52 = vld [vmem:[%s6030_s3 + $0x2c0] sm:$0xf] }
  0xf1   :  { %v859_v61 = vadd.f32 %v858_v59, %v840_v63  ;;  %v877_v62 = vpop.f32.mrf.mxu3  ;;  %v842_v23 = vpop.f32.mrf.mxu1  ;;  %v899_v25 = vmul.f32 0.01, %v769_v15  ;;  %vm891_vm7 = vcmp.gt.f32.partialorder %v769_v15, 0.0  ;;  %v3410_v63 = vld [vmem:[%s6030_s3 + $0x2f8] sm:$0xf0]  ;;  %v3349_v0 = vor.u32 %v4011_v38, %v3346_v45 }
  0xf2   :  { %v823_v19 = vpop.f32.mrf.mxu0  ;;  %v1206_v12 = vunpack.c.l.b16 %v909_v55  ;;  %v1207_v44 = vunpack.c.h.b16 %v909_v55  ;;  %v3413_v50 = vor.u32 %v4027_v48, %v3410_v63  ;;  %v3306_v45 = vld [vmem:[%s6030_s3 + $0x228] sm:$0xf0]  ;;  %v4017_v48 = vld [vmem:[%s6030_s3 + $0x2a4] sm:$0xf] }
  0xf3   :  { %v878_v53 = vadd.f32 %v877_v62, %v859_v61  ;;  %v824_v46 = vadd.f32 %v823_v19, %v805_v58  ;;  %v907_v4 = vsel %vm891_vm7, %v769_v15, %v899_v25  ;;  %v3345_v58 = vor.u32 %v4012_v35, %v3344_v5  ;;  %v3336_v62 = vld [vmem:[%s6030_s3 + $0x260] sm:$0xf]  ;;  %v4010_v19 = vld [vmem:[%s6030_s3 + $0x264] sm:$0xf0]  ;;  %v4005_v15 = vld [vmem:[%s6030_s3 + $0x244] sm:$0xf] }
  0xf4   :  { %v3409_v61 = vor.u32 %v4028_v37, %v3408_v36  ;;  %v4004_v25 = vld [vmem:[%s6030_s3 + $0x234] sm:$0xf0]  ;;  %v3304_v36 = vld [vmem:[%s6030_s3 + $0x220] sm:$0xf]  ;;  %v4002_v37 = vld [vmem:[%s6030_s3 + $0x224] sm:$0xf0] }
  0xf5   :  { %vm888_vm4 = vcmp.gt.f32.partialorder %v878_v53, 0.0  ;;  %v896_v57 = vmul.f32 0.01, %v878_v53  ;;  %v843_v54 = vadd.f32 %v842_v23, %v824_v46  ;;  %v4026_v46 = vld [vmem:[%s6030_s3 + $0x2e4] sm:$0xf0] }
  0xf6   :  { %v4009_v23 = vld [vmem:[%s6030_s3 + $0x264] sm:$0xf]  ;;  %v3370_v63 = vld [vmem:[%s6030_s3 + $0x2a8] sm:$0xf0] }
  0xf7   :  { %v904_v43 = vsel %vm888_vm4, %v878_v53, %v896_v57  ;;  %v3400_v53 = vld [vmem:[%s6030_s3 + $0x2e0] sm:$0xf]  ;;  %v3402_v57 = vld [vmem:[%s6030_s3 + $0x2e8] sm:$0xf0] }
  0xf8   :  { %v910_v6 = vpack.c.bf16 %v904_v43, %v903_v8  ;;  %v861_v49 = vpop.f32.mrf.mxu2  ;;  %v3337_v8 = vor.u32 %v4010_v19, %v3336_v62  ;;  %v3401_v43 = vor.u32 %v4026_v46, %v3400_v53  ;;  %v3405_v51 = vor.u32 %v4025_v1, %v3402_v57  ;;  %v3296_v62 = vld [vmem:[%s6030_s3 + $0x210] sm:$0xf]  ;;  %v4000_v19 = vld [vmem:[%s6030_s3 + $0x214] sm:$0xf0]  ;;  %v4015_v1 = vld [vmem:[%s6030_s3 + $0x294] sm:$0xf] }
  0xf9   :  { %v862_v10 = vadd.f32 %v861_v49, %v843_v54  ;;  %v880_v56 = vpop.f32.mrf.mxu3  ;;  %v844_v60 = vpop.f32.mrf.mxu1  ;;  %v3328_v54 = vld [vmem:[%s6030_s3 + $0x250] sm:$0xf]  ;;  %v3341_v49 = vor.u32 %v4009_v23, %v3338_v3  ;;  %v4016_v46 = vld [vmem:[%s6030_s3 + $0x294] sm:$0xf0]  ;;  %v3999_v23 = vld [vmem:[%s6030_s3 + $0x214] sm:$0xf] }
  0xfa   :  { %v825_v11 = vpop.f32.mrf.mxu0  ;;  %v1208_v28 = vunpack.c.l.b16 %v910_v6  ;;  %v1209_v26 = vunpack.c.h.b16 %v910_v6  ;;  %v4008_v6 = vld [vmem:[%s6030_s3 + $0x254] sm:$0xf0]  ;;  %v3360_v53 = vld [vmem:[%s6030_s3 + $0x290] sm:$0xf]  ;;  %v3298_v3 = vld [vmem:[%s6030_s3 + $0x218] sm:$0xf0] }
  0xfb   :  { %v881_v16 = vadd.f32 %v880_v56, %v862_v10  ;;  %v826_v17 = vadd.f32 %v825_v11, %v807_v9  ;;  %v4024_v9 = vld [vmem:[%s6030_s3 + $0x2d4] sm:$0xf0]  ;;  %v4007_v10 = vld [vmem:[%s6030_s3 + $0x254] sm:$0xf]  ;;  %v3330_v56 = vld [vmem:[%s6030_s3 + $0x258] sm:$0xf0] }
  0xfc   :  { %v5348_v18 = vpack.c.b16 %v1208_v28, %v1206_v12  ;;  %v5351_v20 = vpack.c.b16 %v1209_v26, %v1207_v44  ;;  %v4023_v11 = vld [vmem:[%s6030_s3 + $0x2d4] sm:$0xf]  ;;  %v3394_v12 = vld [vmem:[%s6030_s3 + $0x2d8] sm:$0xf0]  ;;  %v3329_v28 = vor.u32 %v4008_v6, %v3328_v54  ;;  %v3393_v26 = vor.u32 %v4024_v9, %v3392_v7  ;;  %v4006_v44 = vld [vmem:[%s6030_s3 + $0x244] sm:$0xf0] }
  0xfd   :  { %v898_v32 = vmul.f32 0.01, %v881_v16  ;;  %v845_v21 = vadd.f32 %v844_v60, %v826_v17  ;;  %vm890_vm5 = vcmp.gt.f32.partialorder %v881_v16, 0.0  ;;  %v3397_v17 = vor.u32 %v4023_v11, %v3394_v12  ;;  %v4022_v60 = vld [vmem:[%s6030_s3 + $0x2c4] sm:$0xf0] }
  0xfe   :  { %v3321_v24 = vor.u32 %v4006_v44, %v3320_v13  ;;  %v3362_v57 = vld [vmem:[%s6030_s3 + $0x298] sm:$0xf0]  ;;  %v3361_v54 = vor.u32 %v4016_v46, %v3360_v53  ;;  %v3998_v6 = vld [vmem:[%s6030_s3 + $0x204] sm:$0xf0]  ;;  %v3301_v7 = vor.u32 %v3999_v23, %v3298_v3  ;;  %v4013_v11 = vld [vmem:[%s6030_s3 + $0x284] sm:$0xf] }
  0xff   :  { %v906_v27 = vsel %vm890_vm5, %v881_v16, %v898_v32  ;;  %v3333_v16 = vor.u32 %v4007_v10, %v3330_v56  ;;  %v3322_v32 = vld [vmem:[%s6030_s3 + $0x248] sm:$0xf0]  ;;  %v3365_v9 = vor.u32 %v4015_v1, %v3362_v57  ;;  %v3997_v10 = vld [vmem:[%s6030_s3 + $0x204] sm:$0xf]  ;;  %v3568_v13 = vld [vmem:[%s6030_s3 + $0x3f0] sm:$0xf] }
 0x100   :  { %v863_v22 = vpop.f32.mrf.mxu2  ;;  %v911_v31 = vpack.c.bf16 %v906_v27, %v905_v30  ;;  %v3325_v27 = vor.u32 %v4005_v15, %v3322_v32  ;;  %v3376_v30 = vld [vmem:[%s6030_s3 + $0x2b0] sm:$0xf]  ;;  %v3290_v56 = vld [vmem:[%s6030_s3 + $0x208] sm:$0xf0]  ;;  %v4060_v44 = vld [vmem:[%s6030_s3 + $0x3f4] sm:$0xf0] }
 0x101   :  { %v864_v14 = vadd.f32 %v863_v22, %v845_v21  ;;  %v882_v2 = vpop.f32.mrf.mxu3  ;;  %v4021_v21 = vld [vmem:[%s6030_s3 + $0x2c4] sm:$0xf]  ;;  %v3386_v22 = vld [vmem:[%s6030_s3 + $0x2c8] sm:$0xf0]  ;;  %v4059_v15 = vld [vmem:[%s6030_s3 + $0x3f4] sm:$0xf] }
 0x102   :  { %v980_v39 = vunpack.c.l.b16 %v911_v31  ;;  %v981_v40 = vunpack.c.h.b16 %v911_v31  ;;  %v4003_v31 = vld [vmem:[%s6030_s3 + $0x234] sm:$0xf]  ;;  %v3354_v12 = vld [vmem:[%s6030_s3 + $0x288] sm:$0xf0]  ;;  %v3570_v32 = vld [vmem:[%s6030_s3 + $0x3f8] sm:$0xf0] }
 0x103   :  { %v883_v29 = vadd.f32 %v882_v2, %v864_v14  ;;  %v3385_v14 = vor.u32 %v4022_v60, %v3384_v52  ;;  %v3312_v2 = vld [vmem:[%s6030_s3 + $0x230] sm:$0xf]  ;;  %v3506_v60 = vld [vmem:[%s6030_s3 + $0x378] sm:$0xf0]  ;;  %v3544_v23 = vld [vmem:[%s6030_s3 + $0x3c0] sm:$0xf] }
 0x104   :  { %v3313_v5 = vor.u32 %v4004_v25, %v3312_v2  ;;  %v3496_v2 = vld [vmem:[%s6030_s3 + $0x360] sm:$0xf]  ;;  %v4042_v25 = vld [vmem:[%s6030_s3 + $0x364] sm:$0xf0]  ;;  %v4037_v1 = vld [vmem:[%s6030_s3 + $0x344] sm:$0xf] }
 0x105   :  { %vm892_vm8 = vcmp.gt.f32.partialorder %v883_v29, 0.0  ;;  %v900_v47 = vmul.f32 0.01, %v883_v29  ;;  %v4054_v3 = vld [vmem:[%s6030_s3 + $0x3c4] sm:$0xf0] }
 0x106   :  { %v3482_v57 = vld [vmem:[%s6030_s3 + $0x348] sm:$0xf0] }
 0x107   :  { %v908_v33 = vsel %vm892_vm8, %v883_v29, %v900_v47  ;;  %v3389_v29 = vor.u32 %v4021_v21, %v3386_v22  ;;  %v4020_v47 = vld [vmem:[%s6030_s3 + $0x2b4] sm:$0xf0]  ;;  %v3293_v21 = vor.u32 %v3997_v10, %v3290_v56  ;;  %v3357_v22 = vor.u32 %v4013_v11, %v3354_v12  ;;  %v3536_v10 = vld [vmem:[%s6030_s3 + $0x3b0] sm:$0xf]  ;;  %v4035_v11 = vld [vmem:[%s6030_s3 + $0x334] sm:$0xf] }
 0x108   :  { %v912_v34 = vpack.c.bf16 %v908_v33, %v907_v4  ;;  %v3314_v4 = vld [vmem:[%s6030_s3 + $0x238] sm:$0xf0]  ;;  %v4019_v33 = vld [vmem:[%s6030_s3 + $0x2b4] sm:$0xf]  ;;  %v3377_v35 = vor.u32 %v4020_v47, %v3376_v30  ;;  %v3560_v30 = vld [vmem:[%s6030_s3 + $0x3e0] sm:$0xf] }
 0x109   :  { %v3317_v38 = vor.u32 %v4003_v31, %v3314_v4  ;;  %v4058_v47 = vld [vmem:[%s6030_s3 + $0x3e4] sm:$0xf0]  ;;  %v4041_v31 = vld [vmem:[%s6030_s3 + $0x364] sm:$0xf]  ;;  %v3498_v4 = vld [vmem:[%s6030_s3 + $0x368] sm:$0xf0] }
 0x10a   :  { %v982_v41 = vunpack.c.l.b16 %v912_v34  ;;  %v983_v42 = vunpack.c.h.b16 %v912_v34  ;;  %v3378_v34 = vld [vmem:[%s6030_s3 + $0x2b8] sm:$0xf0]  ;;  %v4052_v56 = vld [vmem:[%s6030_s3 + $0x3b4] sm:$0xf0] }
 0x10b   :  { %v3474_v12 = vld [vmem:[%s6030_s3 + $0x338] sm:$0xf0] }
 0x10c   :  { %v5378_v55 = vpack.c.b16 %v982_v41, %v980_v39  ;;  %v5380_v59 = vpack.c.b16 %v983_v42, %v981_v40  ;;  %v3381_v39 = vor.u32 %v4019_v33, %v3378_v34  ;;  %v3368_v40 = vld [vmem:[%s6030_s3 + $0x2a0] sm:$0xf]  ;;  %v4018_v41 = vld [vmem:[%s6030_s3 + $0x2a4] sm:$0xf0]  ;;  %v4001_v42 = vld [vmem:[%s6030_s3 + $0x224] sm:$0xf] }
 0x10d   :  { %v4057_v33 = vld [vmem:[%s6030_s3 + $0x3e4] sm:$0xf]  ;;  %v3562_v34 = vld [vmem:[%s6030_s3 + $0x3e8] sm:$0xf0] }
 0x10e   :  { %1156 = vmatmul.bf16.vlgmr.msrb.gmra.mxu0 %v5378_v55  ;;  %1170 = vmatmul.bf16.vlgmr.msrb.gmra.mxu1 %v5380_v59 }
 0x10f   :  { %1184 = vmatmul.bf16.vlgmr.msrb.gmra.mxu2 %v5378_v55  ;;  %1198 = vmatmul.bf16.vlgmr.msrb.gmra.mxu3 %v5380_v59 }
 0x110   :  { %1627 = vmatpush.bf16.msrb.mxu0 %v3345_v58  ;;  %1641 = vmatpush.bf16.msrb.mxu1 %v3409_v61  ;;  %v3305_v58 = vor.u32 %v4002_v37, %v3304_v36  ;;  %v3369_v61 = vor.u32 %v4018_v41, %v3368_v40  ;;  %v3497_v36 = vor.u32 %v4042_v25, %v3496_v2 }
 0x111   :  { %1655 = vmatpush.bf16.msrb.mxu2 %v3349_v0  ;;  %1669 = vmatpush.bf16.msrb.mxu3 %v3413_v50  ;;  %v3309_v0 = vor.u32 %v4001_v42, %v3306_v45  ;;  %v3373_v50 = vor.u32 %v4017_v48, %v3370_v63  ;;  %v3561_v37 = vor.u32 %v4058_v47, %v3560_v30  ;;  %v3552_v42 = vld [vmem:[%s6030_s3 + $0x3d0] sm:$0xf]  ;;  %v4056_v45 = vld [vmem:[%s6030_s3 + $0x3d4] sm:$0xf0]  ;;  %v4039_v48 = vld [vmem:[%s6030_s3 + $0x354] sm:$0xf] }
 0x112   :  { %v3501_v40 = vor.u32 %v4041_v31, %v3498_v4  ;;  %v3565_v41 = vor.u32 %v4057_v33, %v3562_v34  ;;  %v3490_v63 = vld [vmem:[%s6030_s3 + $0x358] sm:$0xf0]  ;;  %v3520_v31 = vld [vmem:[%s6030_s3 + $0x390] sm:$0xf]  ;;  %v4048_v4 = vld [vmem:[%s6030_s3 + $0x394] sm:$0xf0] }
 0x113   :  { %v3493_v53 = vor.u32 %v4039_v48, %v3490_v63  ;;  %v4031_v33 = vld [vmem:[%s6030_s3 + $0x314] sm:$0xf]  ;;  %v3458_v34 = vld [vmem:[%s6030_s3 + $0x318] sm:$0xf0]  ;;  %v4029_v48 = vld [vmem:[%s6030_s3 + $0x304] sm:$0xf] }
 0x114   :  { %1628 = vmatpush.bf16.msrb.mxu0 %v3337_v8  ;;  %1642 = vmatpush.bf16.msrb.mxu1 %v3401_v43  ;;  %v3288_v8 = vld [vmem:[%s6030_s3 + $0x200] sm:$0xf]  ;;  %v3297_v43 = vor.u32 %v4000_v19, %v3296_v62  ;;  %v3553_v19 = vor.u32 %v4056_v45, %v3552_v42  ;;  %v3461_v42 = vor.u32 %v4031_v33, %v3458_v34  ;;  %v3450_v63 = vld [vmem:[%s6030_s3 + $0x308] sm:$0xf0]  ;;  %v4069_v33 = vld [vmem:[%s6030_s3 + $0x444] sm:$0xf] }
 0x115   :  { %1656 = vmatpush.bf16.msrb.mxu2 %v3341_v49  ;;  %1670 = vmatpush.bf16.msrb.mxu3 %v3405_v51  ;;  %v3352_v49 = vld [vmem:[%s6030_s3 + $0x280] sm:$0xf]  ;;  %v4014_v51 = vld [vmem:[%s6030_s3 + $0x284] sm:$0xf0]  ;;  %v3642_v34 = vld [vmem:[%s6030_s3 + $0x448] sm:$0xf0] }
 0x116   :  { %v3353_v52 = vor.u32 %v4014_v51, %v3352_v49  ;;  %v3472_v49 = vld [vmem:[%s6030_s3 + $0x330] sm:$0xf]  ;;  %v4036_v51 = vld [vmem:[%s6030_s3 + $0x334] sm:$0xf0] }
 0x118   :  { %1629 = vmatpush.bf16.msrb.mxu0 %v3329_v28  ;;  %1643 = vmatpush.bf16.msrb.mxu1 %v3393_v26  ;;  %v3504_v28 = vld [vmem:[%s6030_s3 + $0x370] sm:$0xf]  ;;  %v4044_v26 = vld [vmem:[%s6030_s3 + $0x374] sm:$0xf0] }
 0x119   :  { %1657 = vmatpush.bf16.msrb.mxu2 %v3333_v16  ;;  %1671 = vmatpush.bf16.msrb.mxu3 %v3397_v17  ;;  %v4043_v16 = vld [vmem:[%s6030_s3 + $0x374] sm:$0xf]  ;;  %v3289_v17 = vor.u32 %v3998_v6, %v3288_v8  ;;  %v4053_v8 = vld [vmem:[%s6030_s3 + $0x3c4] sm:$0xf]  ;;  %v3545_v6 = vor.u32 %v4054_v3, %v3544_v23  ;;  %v3666_v3 = vld [vmem:[%s6030_s3 + $0x478] sm:$0xf0] }
 0x11c   :  { %1630 = vmatpush.bf16.msrb.mxu0 %v3321_v24  ;;  %1644 = vmatpush.bf16.msrb.mxu1 %v3385_v14  ;;  %v3505_v24 = vor.u32 %v4044_v26, %v3504_v28  ;;  %v3569_v14 = vor.u32 %v4060_v44, %v3568_v13  ;;  %v4051_v28 = vld [vmem:[%s6030_s3 + $0x3b4] sm:$0xf]  ;;  %v3538_v26 = vld [vmem:[%s6030_s3 + $0x3b8] sm:$0xf0]  ;;  %v3473_v13 = vor.u32 %v4036_v51, %v3472_v49  ;;  %v3656_v49 = vld [vmem:[%s6030_s3 + $0x460] sm:$0xf] }
 0x11d   :  { %1658 = vmatpush.bf16.msrb.mxu2 %v3325_v27  ;;  %1672 = vmatpush.bf16.msrb.mxu3 %v3389_v29  ;;  %v3509_v27 = vor.u32 %v4043_v16, %v3506_v60  ;;  %v3573_v29 = vor.u32 %v4059_v15, %v3570_v32  ;;  %v3537_v44 = vor.u32 %v4052_v56, %v3536_v10  ;;  %v3464_v16 = vld [vmem:[%s6030_s3 + $0x320] sm:$0xf]  ;;  %v4050_v32 = vld [vmem:[%s6030_s3 + $0x3a4] sm:$0xf0] }
 0x11e   :  { %1382 = vmatmul.bf16.vlgmr.msra.gmra.mxu0 %v5348_v18  ;;  %1396 = vmatmul.bf16.vlgmr.msra.gmra.mxu1 %v5351_v20  ;;  %v3541_v60 = vor.u32 %v4051_v28, %v3538_v26  ;;  %v3528_v15 = vld [vmem:[%s6030_s3 + $0x3a0] sm:$0xf]  ;;  %v4074_v51 = vld [vmem:[%s6030_s3 + $0x464] sm:$0xf0]  ;;  %v4089_v28 = vld [vmem:[%s6030_s3 + $0x4e4] sm:$0xf] }
 0x11f   :  { %1410 = vmatmul.bf16.vlgmr.msra.gmra.mxu2 %v5348_v18  ;;  %1424 = vmatmul.bf16.vlgmr.msra.gmra.mxu3 %v5351_v20  ;;  %v3529_v25 = vor.u32 %v4050_v32, %v3528_v15  ;;  %v3720_v10 = vld [vmem:[%s6030_s3 + $0x4e0] sm:$0xf]  ;;  %v4090_v56 = vld [vmem:[%s6030_s3 + $0x4e4] sm:$0xf0]  ;;  %v3722_v26 = vld [vmem:[%s6030_s3 + $0x4e8] sm:$0xf0] }
 0x120   :  { %1631 = vmatpush.bf16.msrb.mxu0 %v3313_v5  ;;  %1645 = vmatpush.bf16.msrb.mxu1 %v3377_v35  ;;  %v1463_v5 = vrot.slane %v5348_v18, 1  ;;  %v1464_v35 = vrot.slane %v5351_v20, 1  ;;  %v3725_v32 = vor.u32 %v4089_v28, %v3722_v26  ;;  %v4079_v28 = vld [vmem:[%s6030_s3 + $0x494] sm:$0xf]  ;;  %v3682_v26 = vld [vmem:[%s6030_s3 + $0x498] sm:$0xf0] }
 0x121   :  { %1659 = vmatpush.bf16.msrb.mxu2 %v3317_v38  ;;  %1673 = vmatpush.bf16.msrb.mxu3 %v3381_v39  ;;  %v3488_v38 = vld [vmem:[%s6030_s3 + $0x350] sm:$0xf]  ;;  %v4040_v39 = vld [vmem:[%s6030_s3 + $0x354] sm:$0xf0] }
 0x122   :  { %v3489_v62 = vor.u32 %v4040_v39, %v3488_v38  ;;  %v3521_v38 = vor.u32 %v4048_v4, %v3520_v31  ;;  %v4030_v39 = vld [vmem:[%s6030_s3 + $0x304] sm:$0xf0]  ;;  %v3704_v31 = vld [vmem:[%s6030_s3 + $0x4c0] sm:$0xf] }
 0x123   :  { %v4086_v4 = vld [vmem:[%s6030_s3 + $0x4c4] sm:$0xf0] }
 0x124   :  { %1632 = vmatpush.bf16.msrb.mxu0 %v3305_v58  ;;  %1646 = vmatpush.bf16.msrb.mxu1 %v3369_v61  ;;  %v4055_v58 = vld [vmem:[%s6030_s3 + $0x3d4] sm:$0xf]  ;;  %v3554_v61 = vld [vmem:[%s6030_s3 + $0x3d8] sm:$0xf0] }
 0x125   :  { %1660 = vmatpush.bf16.msrb.mxu2 %v3309_v0  ;;  %1674 = vmatpush.bf16.msrb.mxu3 %v3373_v50  ;;  %v3480_v0 = vld [vmem:[%s6030_s3 + $0x340] sm:$0xf]  ;;  %v4038_v50 = vld [vmem:[%s6030_s3 + $0x344] sm:$0xf0]  ;;  %v3557_v46 = vor.u32 %v4055_v58, %v3554_v61  ;;  %v4045_v58 = vld [vmem:[%s6030_s3 + $0x384] sm:$0xf] }
 0x126   :  { %v3514_v61 = vld [vmem:[%s6030_s3 + $0x388] sm:$0xf0] }
 0x128   :  { %1633 = vmatpush.bf16.msrb.mxu0 %v3297_v43  ;;  %1647 = vmatpush.bf16.msrb.mxu1 %v3361_v54  ;;  %v3546_v43 = vld [vmem:[%s6030_s3 + $0x3c8] sm:$0xf0]  ;;  %v3481_v54 = vor.u32 %v4038_v50, %v3480_v0  ;;  %v3728_v0 = vld [vmem:[%s6030_s3 + $0x4f0] sm:$0xf]  ;;  %v4092_v50 = vld [vmem:[%s6030_s3 + $0x4f4] sm:$0xf0] }
 0x129   :  { %1661 = vmatpush.bf16.msrb.mxu2 %v3301_v7  ;;  %1675 = vmatpush.bf16.msrb.mxu3 %v3365_v9  ;;  %v3485_v7 = vor.u32 %v4037_v1, %v3482_v57  ;;  %v3549_v9 = vor.u32 %v4053_v8, %v3546_v43  ;;  %v4091_v1 = vld [vmem:[%s6030_s3 + $0x4f4] sm:$0xf]  ;;  %v3730_v57 = vld [vmem:[%s6030_s3 + $0x4f8] sm:$0xf0]  ;;  %v3453_v8 = vor.u32 %v4029_v48, %v3450_v63 }
 0x12a   :  { %v3517_v43 = vor.u32 %v4045_v58, %v3514_v61  ;;  %v4067_v48 = vld [vmem:[%s6030_s3 + $0x434] sm:$0xf]  ;;  %v3634_v63 = vld [vmem:[%s6030_s3 + $0x438] sm:$0xf0] }
 0x12b   :  { %v4083_v58 = vld [vmem:[%s6030_s3 + $0x4b4] sm:$0xf]  ;;  %v3698_v61 = vld [vmem:[%s6030_s3 + $0x4b8] sm:$0xf0] }
 0x12c   :  { %1634 = vmatpush.bf16.msrb.mxu0 %v3289_v17  ;;  %1648 = vmatpush.bf16.msrb.mxu1 %v3353_v52  ;;  %v4034_v17 = vld [vmem:[%s6030_s3 + $0x324] sm:$0xf0]  ;;  %v3477_v52 = vor.u32 %v4035_v11, %v3474_v12  ;;  %v4073_v11 = vld [vmem:[%s6030_s3 + $0x464] sm:$0xf]  ;;  %v3658_v12 = vld [vmem:[%s6030_s3 + $0x468] sm:$0xf0] }
 0x12d   :  { %1662 = vmatpush.bf16.msrb.mxu2 %v3293_v21  ;;  %1676 = vmatpush.bf16.msrb.mxu3 %v3357_v22  ;;  %v4033_v21 = vld [vmem:[%s6030_s3 + $0x324] sm:$0xf]  ;;  %v3466_v22 = vld [vmem:[%s6030_s3 + $0x328] sm:$0xf0]  ;;  %v3465_v2 = vor.u32 %v4034_v17, %v3464_v16  ;;  %v3657_v16 = vor.u32 %v4074_v51, %v3656_v49  ;;  %v3721_v17 = vor.u32 %v4090_v56, %v3720_v10  ;;  %v3616_v49 = vld [vmem:[%s6030_s3 + $0x410] sm:$0xf] }
 0x12e   :  { %v3469_v30 = vor.u32 %v4033_v21, %v3466_v22  ;;  %v3661_v15 = vor.u32 %v4073_v11, %v3658_v12  ;;  %v4071_v21 = vld [vmem:[%s6030_s3 + $0x454] sm:$0xf]  ;;  %v3650_v22 = vld [vmem:[%s6030_s3 + $0x458] sm:$0xf0]  ;;  %v4064_v51 = vld [vmem:[%s6030_s3 + $0x414] sm:$0xf0] }
 0x12f   :  { %1635 = vmatmul.bf16.vlgmr.msrb.gmra.mxu0 %v1463_v5  ;;  %1649 = vmatmul.bf16.vlgmr.msrb.gmra.mxu1 %v1464_v35  ;;  %v3680_v10 = vld [vmem:[%s6030_s3 + $0x490] sm:$0xf]  ;;  %v4080_v56 = vld [vmem:[%s6030_s3 + $0x494] sm:$0xf0]  ;;  %v4063_v11 = vld [vmem:[%s6030_s3 + $0x414] sm:$0xf] }
 0x130   :  { %1884 = vmatpush.bf16.msra.mxu0 %v3505_v24  ;;  %1898 = vmatpush.bf16.msra.mxu1 %v3569_v14  ;;  %v4049_v24 = vld [vmem:[%s6030_s3 + $0x3a4] sm:$0xf]  ;;  %v3530_v14 = vld [vmem:[%s6030_s3 + $0x3a8] sm:$0xf0]  ;;  %v3618_v12 = vld [vmem:[%s6030_s3 + $0x418] sm:$0xf0] }
 0x131   :  { %1912 = vmatpush.bf16.msra.mxu2 %v3509_v27  ;;  %1926 = vmatpush.bf16.msra.mxu3 %v3573_v29  ;;  %v3456_v27 = vld [vmem:[%s6030_s3 + $0x310] sm:$0xf]  ;;  %v4032_v29 = vld [vmem:[%s6030_s3 + $0x314] sm:$0xf0]  ;;  %v3533_v47 = vor.u32 %v4049_v24, %v3530_v14  ;;  %v4087_v24 = vld [vmem:[%s6030_s3 + $0x4d4] sm:$0xf] }
 0x132   :  { %1663 = vmatmul.bf16.vlgmr.msrb.gmra.mxu2 %v1463_v5  ;;  %1677 = vmatmul.bf16.vlgmr.msrb.gmra.mxu3 %v1464_v35  ;;  %v4047_v5 = vld [vmem:[%s6030_s3 + $0x394] sm:$0xf]  ;;  %v3522_v35 = vld [vmem:[%s6030_s3 + $0x398] sm:$0xf0] }
 0x133   :  { %v3525_v45 = vor.u32 %v4047_v5, %v3522_v35  ;;  %v3714_v14 = vld [vmem:[%s6030_s3 + $0x4d8] sm:$0xf0]  ;;  %v4085_v5 = vld [vmem:[%s6030_s3 + $0x4c4] sm:$0xf]  ;;  %v3706_v35 = vld [vmem:[%s6030_s3 + $0x4c8] sm:$0xf0] }
 0x134   :  { %1885 = vmatpush.bf16.msra.mxu0 %v3497_v36  ;;  %1899 = vmatpush.bf16.msra.mxu1 %v3561_v37  ;;  %v3448_v36 = vld [vmem:[%s6030_s3 + $0x300] sm:$0xf]  ;;  %v3457_v37 = vor.u32 %v4032_v29, %v3456_v27  ;;  %v4070_v29 = vld [vmem:[%s6030_s3 + $0x444] sm:$0xf0] }
 0x135   :  { %1913 = vmatpush.bf16.msra.mxu2 %v3501_v40  ;;  %1927 = vmatpush.bf16.msra.mxu3 %v3565_v41  ;;  %v3512_v40 = vld [vmem:[%s6030_s3 + $0x380] sm:$0xf]  ;;  %v4046_v41 = vld [vmem:[%s6030_s3 + $0x384] sm:$0xf0] }
 0x136   :  { %v3513_v23 = vor.u32 %v4046_v41, %v3512_v40  ;;  %v3640_v27 = vld [vmem:[%s6030_s3 + $0x440] sm:$0xf]  ;;  %v3645_v40 = vor.u32 %v4069_v33, %v3642_v34  ;;  %v3709_v41 = vor.u32 %v4085_v5, %v3706_v35 }
 0x138   :  { %1886 = vmatpush.bf16.msra.mxu0 %v3489_v62  ;;  %1900 = vmatpush.bf16.msra.mxu1 %v3553_v19  ;;  %v3664_v62 = vld [vmem:[%s6030_s3 + $0x470] sm:$0xf]  ;;  %v4076_v19 = vld [vmem:[%s6030_s3 + $0x474] sm:$0xf0] }
 0x139   :  { %1914 = vmatpush.bf16.msra.mxu2 %v3493_v53  ;;  %1928 = vmatpush.bf16.msra.mxu3 %v3557_v46  ;;  %v4075_v53 = vld [vmem:[%s6030_s3 + $0x474] sm:$0xf]  ;;  %v3449_v46 = vor.u32 %v4030_v39, %v3448_v36  ;;  %v3641_v36 = vor.u32 %v4070_v29, %v3640_v27  ;;  %v4068_v39 = vld [vmem:[%s6030_s3 + $0x434] sm:$0xf0]  ;;  %v1977_v27 = vrot.slane %v5348_v18, 2  ;;  %v1978_v29 = vrot.slane %v5351_v20, 2 }
 0x13c   :  { %1887 = vmatpush.bf16.msra.mxu0 %v3481_v54  ;;  %1901 = vmatpush.bf16.msra.mxu1 %v3545_v6  ;;  %v3665_v54 = vor.u32 %v4076_v19, %v3664_v62  ;;  %v3729_v6 = vor.u32 %v4092_v50, %v3728_v0  ;;  %v3624_v0 = vld [vmem:[%s6030_s3 + $0x420] sm:$0xf]  ;;  %v4066_v50 = vld [vmem:[%s6030_s3 + $0x424] sm:$0xf0] }
 0x13d   :  { %1915 = vmatpush.bf16.msra.mxu2 %v3485_v7  ;;  %1929 = vmatpush.bf16.msra.mxu3 %v3549_v9  ;;  %v3669_v7 = vor.u32 %v4075_v53, %v3666_v3  ;;  %v3733_v9 = vor.u32 %v4091_v1, %v3730_v57  ;;  %v3637_v53 = vor.u32 %v4067_v48, %v3634_v63  ;;  %v4082_v3 = vld [vmem:[%s6030_s3 + $0x4a4] sm:$0xf0]  ;;  %v4065_v1 = vld [vmem:[%s6030_s3 + $0x424] sm:$0xf]  ;;  %v3626_v57 = vld [vmem:[%s6030_s3 + $0x428] sm:$0xf0] }
 0x140   :  { %1888 = vmatpush.bf16.msra.mxu0 %v3473_v13  ;;  %1902 = vmatpush.bf16.msra.mxu1 %v3537_v44  ;;  %v1720_v13 = vrot.slane %v5378_v55, 1  ;;  %v1721_v44 = vrot.slane %v5380_v59, 1  ;;  %v3712_v55 = vld [vmem:[%s6030_s3 + $0x4d0] sm:$0xf]  ;;  %v4088_v59 = vld [vmem:[%s6030_s3 + $0x4d4] sm:$0xf0] }
 0x141   :  { %1916 = vmatpush.bf16.msra.mxu2 %v3477_v52  ;;  %1930 = vmatpush.bf16.msra.mxu3 %v3541_v60  ;;  %v3648_v52 = vld [vmem:[%s6030_s3 + $0x450] sm:$0xf]  ;;  %v4072_v60 = vld [vmem:[%s6030_s3 + $0x454] sm:$0xf0] }
 0x144   :  { %1889 = vmatpush.bf16.msra.mxu0 %v3465_v2  ;;  %1903 = vmatpush.bf16.msra.mxu1 %v3529_v25  ;;  %v3649_v2 = vor.u32 %v4072_v60, %v3648_v52  ;;  %v3713_v25 = vor.u32 %v4088_v59, %v3712_v55  ;;  %v3621_v52 = vor.u32 %v4063_v11, %v3618_v12  ;;  %v4061_v55 = vld [vmem:[%s6030_s3 + $0x404] sm:$0xf]  ;;  %v3610_v59 = vld [vmem:[%s6030_s3 + $0x408] sm:$0xf0] }
 0x145   :  { %1917 = vmatpush.bf16.msra.mxu2 %v3469_v30  ;;  %1931 = vmatpush.bf16.msra.mxu3 %v3533_v47  ;;  %v3653_v30 = vor.u32 %v4071_v21, %v3650_v22  ;;  %v3717_v47 = vor.u32 %v4087_v24, %v3714_v14  ;;  %v3685_v60 = vor.u32 %v4079_v28, %v3682_v26  ;;  %v4077_v21 = vld [vmem:[%s6030_s3 + $0x484] sm:$0xf]  ;;  %v3674_v22 = vld [vmem:[%s6030_s3 + $0x488] sm:$0xf0] }
 0x148   :  { %1890 = vmatpush.bf16.msra.mxu0 %v3457_v37  ;;  %1904 = vmatpush.bf16.msra.mxu1 %v3521_v38  ;;  %v3705_v37 = vor.u32 %v4086_v4, %v3704_v31  ;;  %v3632_v38 = vld [vmem:[%s6030_s3 + $0x430] sm:$0xf] }
 0x149   :  { %1918 = vmatpush.bf16.msra.mxu2 %v3461_v42  ;;  %1932 = vmatpush.bf16.msra.mxu3 %v3525_v45  ;;  %v3696_v42 = vld [vmem:[%s6030_s3 + $0x4b0] sm:$0xf]  ;;  %v4084_v45 = vld [vmem:[%s6030_s3 + $0x4b4] sm:$0xf0]  ;;  %v3633_v62 = vor.u32 %v4068_v39, %v3632_v38 }
 0x14a   :  { %v3697_v19 = vor.u32 %v4084_v45, %v3696_v42 }
 0x14c   :  { %1891 = vmatpush.bf16.msra.mxu0 %v3449_v46  ;;  %1905 = vmatpush.bf16.msra.mxu1 %v3513_v23  ;;  %v3701_v46 = vor.u32 %v4083_v58, %v3698_v61  ;;  %v3688_v23 = vld [vmem:[%s6030_s3 + $0x4a0] sm:$0xf] }
 0x14d   :  { %1919 = vmatpush.bf16.msra.mxu2 %v3453_v8  ;;  %1933 = vmatpush.bf16.msra.mxu3 %v3517_v43  ;;  %v4081_v8 = vld [vmem:[%s6030_s3 + $0x4a4] sm:$0xf]  ;;  %v3690_v43 = vld [vmem:[%s6030_s3 + $0x4a8] sm:$0xf0] }
 0x14f   :  { %1892 = vmatmul.bf16.vlgmr.msra.gmra.mxu0 %v1720_v13  ;;  %1906 = vmatmul.bf16.vlgmr.msra.gmra.mxu1 %v1721_v44 }
 0x150   :  { %2141 = vmatpush.bf16.msrb.mxu0 %v3665_v54  ;;  %2155 = vmatpush.bf16.msrb.mxu1 %v3729_v6  ;;  %v3625_v54 = vor.u32 %v4066_v50, %v3624_v0  ;;  %v3689_v6 = vor.u32 %v4082_v3, %v3688_v23 }
 0x151   :  { %2169 = vmatpush.bf16.msrb.mxu2 %v3669_v7  ;;  %2183 = vmatpush.bf16.msrb.mxu3 %v3733_v9  ;;  %v3629_v7 = vor.u32 %v4065_v1, %v3626_v57  ;;  %v3693_v9 = vor.u32 %v4081_v8, %v3690_v43 }
 0x152   :  { %1920 = vmatmul.bf16.vlgmr.msra.gmra.mxu2 %v1720_v13  ;;  %1934 = vmatmul.bf16.vlgmr.msra.gmra.mxu3 %v1721_v44  ;;  %v3617_v13 = vor.u32 %v4064_v51, %v3616_v49  ;;  %v3681_v44 = vor.u32 %v4080_v56, %v3680_v10 }
 0x154   :  { %2142 = vmatpush.bf16.msrb.mxu0 %v3657_v16  ;;  %2156 = vmatpush.bf16.msrb.mxu1 %v3721_v17  ;;  %v3608_v16 = vld [vmem:[%s6030_s3 + $0x400] sm:$0xf]  ;;  %v4062_v17 = vld [vmem:[%s6030_s3 + $0x404] sm:$0xf0] }
 0x155   :  { %2170 = vmatpush.bf16.msrb.mxu2 %v3661_v15  ;;  %2184 = vmatpush.bf16.msrb.mxu3 %v3725_v32  ;;  %v3672_v15 = vld [vmem:[%s6030_s3 + $0x480] sm:$0xf]  ;;  %v4078_v32 = vld [vmem:[%s6030_s3 + $0x484] sm:$0xf0]  ;;  %v3609_v24 = vor.u32 %v4062_v17, %v3608_v16  ;;  %s2545_s3 = sshll.u32 %s6036_s9, 4  ;;  %s2546_s3 = int_to_ptr.hbm [resolvable:$true] %s2545_s3 }
 0x156   :  { %v3673_v14 = vor.u32 %v4078_v32, %v3672_v15 }
 0x158   :  { %2143 = vmatpush.bf16.msrb.mxu0 %v3649_v2  ;;  %2157 = vmatpush.bf16.msrb.mxu1 %v3713_v25  ;;  %v3613_v2 = vor.u32 %v4061_v55, %v3610_v59  ;;  %v3677_v25 = vor.u32 %v4077_v21, %v3674_v22  ;;  %v2201_v22 = vld [vmem:[%s6031_s4] sm:$0x3] }
 0x159   :  { %2171 = vmatpush.bf16.msrb.mxu2 %v3653_v30  ;;  %2185 = vmatpush.bf16.msrb.mxu3 %v3717_v47 }
 0x15c   :  { %2144 = vmatpush.bf16.msrb.mxu0 %v3641_v36  ;;  %2158 = vmatpush.bf16.msrb.mxu1 %v3705_v37 }
 0x15d   :  { %2172 = vmatpush.bf16.msrb.mxu2 %v3645_v40  ;;  %2186 = vmatpush.bf16.msrb.mxu3 %v3709_v41 }
 0x160   :  { %2145 = vmatpush.bf16.msrb.mxu0 %v3633_v62  ;;  %2159 = vmatpush.bf16.msrb.mxu1 %v3697_v19 }
 0x161   :  { %2173 = vmatpush.bf16.msrb.mxu2 %v3637_v53  ;;  %2187 = vmatpush.bf16.msrb.mxu3 %v3701_v46 }
 0x164   :  { %2146 = vmatpush.bf16.msrb.mxu0 %v3625_v54  ;;  %2160 = vmatpush.bf16.msrb.mxu1 %v3689_v6 }
 0x165   :  { %2174 = vmatpush.bf16.msrb.mxu2 %v3629_v7  ;;  %2188 = vmatpush.bf16.msrb.mxu3 %v3693_v9 }
 0x168   :  { %2147 = vmatpush.bf16.msrb.mxu0 %v3617_v13  ;;  %2161 = vmatpush.bf16.msrb.mxu1 %v3681_v44 }
 0x169   :  { %2175 = vmatpush.bf16.msrb.mxu2 %v3621_v52  ;;  %2189 = vmatpush.bf16.msrb.mxu3 %v3685_v60 }
 0x16c   :  { %2148 = vmatpush.bf16.msrb.mxu0 %v3609_v24  ;;  %2162 = vmatpush.bf16.msrb.mxu1 %v3673_v14 }
 0x16d   :  { %2176 = vmatpush.bf16.msrb.mxu2 %v3613_v2  ;;  %2190 = vmatpush.bf16.msrb.mxu3 %v3677_v25 }
 0x16f   :  { %2149 = vmatmul.bf16.vlgmr.msrb.gmra.mxu0 %v1977_v27  ;;  %2163 = vmatmul.bf16.vlgmr.msrb.gmra.mxu1 %v1978_v29 }
 0x170   :  { %2177 = vmatmul.bf16.vlgmr.msrb.gmra.mxu2 %v1977_v27  ;;  %2191 = vmatmul.bf16.vlgmr.msrb.gmra.mxu3 %v1978_v29  ;;  %v4108_v29 = vld [vmem:[%s6032_s5 + $0x78] sm:$0xff] }
 0x171   :  { %2371 = vmatpush.bf16.msra.mxu0 %v4108_v29 }
 0x18b   :  { %v1157_v30 = vpop.f32.mrf.mxu0  ;;  %v1171_v47 = vpop.f32.mrf.mxu1 }
 0x18c   :  { %v1172_v31 = vadd.f32 %v1171_v47, %v1157_v30  ;;  %v4100_v30 = vld [vmem:[%s6032_s5 + $0x38] sm:$0xff] }
 0x18d   :  { %2432 = vmatpush.bf16.msra.mxu1 %v4100_v30 }
 0x192   :  { %v1185_v4 = vpop.f32.mrf.mxu2  ;;  %v1199_v33 = vpop.f32.mrf.mxu3 }
 0x193   :  { %v1200_v34 = vadd.f32 %v1199_v33, %v1185_v4  ;;  %v1159_v5 = vpop.f32.mrf.mxu0  ;;  %v1173_v35 = vpop.f32.mrf.mxu1 }
 0x194   :  { %v1174_v8 = vadd.f32 %v1173_v35, %v1159_v5  ;;  %v4107_v35 = vld [vmem:[%s6032_s5 + $0x70] sm:$0xff] }
 0x195   :  { %2372 = vmatpush.bf16.msra.mxu0 %v4107_v35 }
 0x19a   :  { %v1187_v36 = vpop.f32.mrf.mxu2  ;;  %v1201_v37 = vpop.f32.mrf.mxu3 }
 0x19b   :  { %v1383_v38 = vpop.f32.mrf.mxu0  ;;  %v1397_v39 = vpop.f32.mrf.mxu1  ;;  %v1202_v12 = vadd.f32 %v1201_v37, %v1187_v36  ;;  %v4099_v36 = vld [vmem:[%s6032_s5 + $0x30] sm:$0xff] }
 0x19c   :  { %v1384_v7 = vadd.f32 %v1383_v38, %v1172_v31  ;;  %2433 = vmatpush.bf16.msra.mxu1 %v4099_v36 }
 0x19e   :  { %v1398_v13 = vadd.f32 %v1397_v39, %v1384_v7 }
 0x1a2   :  { %v1411_v40 = vpop.f32.mrf.mxu2  ;;  %v1425_v18 = vpop.f32.mrf.mxu3 }
 0x1a3   :  { %v1385_v41 = vpop.f32.mrf.mxu0  ;;  %v1399_v20 = vpop.f32.mrf.mxu1  ;;  %v1412_v9 = vadd.f32 %v1411_v40, %v1200_v34  ;;  %v2203_v34 = vperm.slane %v2201_v22, 0  ;;  %v2204_v40 = vperm.slane %v2201_v22, 1  ;;  %v4095_v22 = vld [vmem:[%s6032_s5 + $0x10] sm:$0xff] }
 0x1a4   :  { %v1386_v51 = vadd.f32 %v1385_v41, %v1174_v8 }
 0x1a5   :  { %v1426_v44 = vadd.f32 %v1425_v18, %v1412_v9 }
 0x1a6   :  { %v1400_v28 = vadd.f32 %v1399_v20, %v1386_v51 }
 0x1aa   :  { %v1413_v42 = vpop.f32.mrf.mxu2  ;;  %v1427_v45 = vpop.f32.mrf.mxu3 }
 0x1ab   :  { %v1414_v52 = vadd.f32 %v1413_v42, %v1202_v12 }
 0x1ac   :  { %v1636_v48 = vpop.f32.mrf.mxu0  ;;  %v1650_v63 = vpop.f32.mrf.mxu1 }
 0x1ad   :  { %v1651_v56 = vadd.f32 %v1650_v63, %v1636_v48  ;;  %v1428_v33 = vadd.f32 %v1427_v45, %v1414_v52  ;;  %v4106_v48 = vld [vmem:[%s6032_s5 + $0x68] sm:$0xff] }
 0x1ae   :  { %v4098_v63 = vld [vmem:[%s6032_s5 + $0x28] sm:$0xff]  ;;  %2373 = vmatpush.bf16.msra.mxu0 %v4106_v48 }
 0x1af   :  { %v1683_v55 = vadd.f32 %v1651_v56, %v1398_v13  ;;  %2434 = vmatpush.bf16.msra.mxu1 %v4098_v63 }
 0x1b4   :  { %v1638_v62 = vpop.f32.mrf.mxu0  ;;  %v1652_v19 = vpop.f32.mrf.mxu1 }
 0x1b5   :  { %v1664_v58 = vpop.f32.mrf.mxu2  ;;  %v1678_v61 = vpop.f32.mrf.mxu3  ;;  %v1653_v10 = vadd.f32 %v1652_v19, %v1638_v62 }
 0x1b6   :  { %v1679_v11 = vadd.f32 %v1678_v61, %v1664_v58 }
 0x1b7   :  { %v1685_v60 = vadd.f32 %v1653_v10, %v1400_v28 }
 0x1b8   :  { %v1684_v59 = vadd.f32 %v1679_v11, %v1426_v44 }
 0x1bd   :  { %v1666_v0 = vpop.f32.mrf.mxu2  ;;  %v1680_v50 = vpop.f32.mrf.mxu3 }
 0x1be   :  { %v1681_v47 = vadd.f32 %v1680_v50, %v1666_v0 }
 0x1c0   :  { %v1686_v41 = vadd.f32 %v1681_v47, %v1428_v33 }
 0x1cc   :  { %v1893_v53 = vpop.f32.mrf.mxu0  ;;  %v1907_v46 = vpop.f32.mrf.mxu1 }
 0x1cd   :  { %v1908_v16 = vadd.f32 %v1907_v46, %v1893_v53  ;;  %v4105_v53 = vld [vmem:[%s6032_s5 + $0x60] sm:$0xff] }
 0x1ce   :  { %v4097_v46 = vld [vmem:[%s6032_s5 + $0x20] sm:$0xff]  ;;  %2374 = vmatpush.bf16.msra.mxu0 %v4105_v53 }
 0x1cf   :  { %v1940_v31 = vadd.f32 %v1908_v16, %v1683_v55  ;;  %2435 = vmatpush.bf16.msra.mxu1 %v4097_v46  ;;  %v4103_v55 = vld [vmem:[%s6032_s5 + $0x50] sm:$0xff] }
 0x1d4   :  { %v1895_v1 = vpop.f32.mrf.mxu0  ;;  %v1909_v57 = vpop.f32.mrf.mxu1 }
 0x1d5   :  { %v1921_v23 = vpop.f32.mrf.mxu2  ;;  %v1935_v3 = vpop.f32.mrf.mxu3  ;;  %v1910_v26 = vadd.f32 %v1909_v57, %v1895_v1 }
 0x1d6   :  { %v1936_v17 = vadd.f32 %v1935_v3, %v1921_v23 }
 0x1d7   :  { %v1942_v25 = vadd.f32 %v1910_v26, %v1685_v60 }
 0x1d8   :  { %v1941_v4 = vadd.f32 %v1936_v17, %v1684_v59  ;;  %v4096_v59 = vld [vmem:[%s6032_s5 + $0x18] sm:$0xff] }
 0x1d9   :  { %2436 = vmatpush.bf16.msra.mxu1 %v4096_v59 }
 0x1dd   :  { %v1923_v43 = vpop.f32.mrf.mxu2  ;;  %v1937_v54 = vpop.f32.mrf.mxu3  ;;  %2437 = vmatpush.bf16.msra.mxu1 %v4095_v22 }
 0x1de   :  { %v1938_v37 = vadd.f32 %v1937_v54, %v1923_v43  ;;  %v4104_v43 = vld [vmem:[%s6032_s5 + $0x58] sm:$0xff] }
 0x1df   :  { %2375 = vmatpush.bf16.msra.mxu0 %v4104_v43 }
 0x1e0   :  { %v1943_v58 = vadd.f32 %v1938_v37, %v1686_v41 }
 0x1e3   :  { %2376 = vmatpush.bf16.msra.mxu0 %v4103_v55 }
 0x1ec   :  { %v2150_v6 = vpop.f32.mrf.mxu0  ;;  %v2164_v49 = vpop.f32.mrf.mxu1 }
 0x1ed   :  { %v2165_v21 = vadd.f32 %v2164_v49, %v2150_v6 }
 0x1ef   :  { %v2197_v38 = vadd.f32 %v2165_v21, %v1940_v31  ;;  %v4102_v21 = vld [vmem:[%s6032_s5 + $0x48] sm:$0xff] }
 0x1f0   :  { %2377 = vmatpush.bf16.msra.mxu0 %v4102_v21 }
 0x1f1   :  { %v2207_v61 = vadd.f32 %v2203_v34, %v2197_v38 }
 0x1f3   :  { %v2178_v15 = vpop.f32.mrf.mxu2  ;;  %v2192_v32 = vpop.f32.mrf.mxu3  ;;  %v2215_v23 = vmul.f32 0.01, %v2207_v61  ;;  %vm2211_vm10 = vcmp.gt.f32.partialorder %v2207_v61, 0.0 }
 0x1f4   :  { %v2193_v24 = vadd.f32 %v2192_v32, %v2178_v15  ;;  %v2152_v14 = vpop.f32.mrf.mxu0  ;;  %v2166_v2 = vpop.f32.mrf.mxu1 }
 0x1f5   :  { %v2167_v27 = vadd.f32 %v2166_v2, %v2152_v14  ;;  %v2219_v54 = vsel %vm2211_vm10, %v2207_v61, %v2215_v23  ;;  %v4094_v14 = vld [vmem:[%s6032_s5 + $0x8] sm:$0xff]  ;;  %v4093_v2 = vld [vmem:[%s6032_s5] sm:$0xff]  ;;  %v4111_v61 = vld [vmem:[%s6034_s7 + $0x10] sm:$0xff] }
 0x1f6   :  { %v2198_v39 = vadd.f32 %v2193_v24, %v1941_v4  ;;  %v2225_v26 = vrot.slane %v2219_v54, 2  ;;  %v2231_v52 = vrot.slane %v2219_v54, 4  ;;  %v4101_v24 = vld [vmem:[%s6032_s5 + $0x40] sm:$0xff]  ;;  %2438 = vmatpush.bf16.msra.mxu1 %v4094_v14 }
 0x1f7   :  { %v2199_v5 = vadd.f32 %v2167_v27, %v1942_v25  ;;  %2378 = vmatpush.bf16.msra.mxu0 %v4101_v24 }
 0x1f8   :  { %v2208_v62 = vadd.f32 %v2204_v40, %v2198_v39  ;;  %v2229_v16 = vmax.f32 %v2219_v54, %v2225_v26 }
 0x1f9   :  { %v2209_v18 = vadd.f32 %v2203_v34, %v2199_v5 }
 0x1fa   :  { %v2216_v3 = vmul.f32 0.01, %v2208_v62  ;;  %vm2212_vm11 = vcmp.gt.f32.partialorder %v2208_v62, 0.0  ;;  %v2235_v15 = vmax.f32 %v2229_v16, %v2231_v52  ;;  %2439 = vmatpush.bf16.msra.mxu1 %v4093_v2 }
 0x1fb   :  { %vm2213_vm9 = vcmp.gt.f32.partialorder %v2209_v18, 0.0  ;;  %v2217_v20 = vmul.f32 0.01, %v2209_v18  ;;  %v2180_v42 = vpop.f32.mrf.mxu2  ;;  %v2194_v45 = vpop.f32.mrf.mxu3 }
 0x1fc   :  { %v2195_v19 = vadd.f32 %v2194_v45, %v2180_v42  ;;  %v2220_v6 = vsel %vm2212_vm11, %v2208_v62, %v2216_v3  ;;  %v4110_v62 = vld [vmem:[%s6034_s7 + $0x8] sm:$0xff] }
 0x1fd   :  { %v2221_v50 = vsel %vm2213_vm9, %v2209_v18, %v2217_v20  ;;  %v2226_v11 = vrot.slane %v2220_v6, 2  ;;  %v2232_v17 = vrot.slane %v2220_v6, 4 }
 0x1fe   :  { %v2200_v0 = vadd.f32 %v2195_v19, %v1943_v58  ;;  %v2274_v57 = vrot.slane %v2221_v50, 2  ;;  %v2280_v10 = vrot.slane %v2221_v50, 4  ;;  %v4112_v58 = vld [vmem:[%s6034_s7 + $0x18] sm:$0xff]  ;;  %v4109_v19 = vld [vmem:[%s6034_s7] sm:$0xff]  ;;  %s4174_s7 = smov 122  }
 0x1ff   :  { %v2230_v44 = vmax.f32 %v2220_v6, %v2226_v11  ;;  %2497 = vmatpush.bf16.msra.mxu2 %v4112_v58  ;;  %v4142_v50 = vld [vmem:[%s6033_s6] ss:$0 sm:$0xff] }
 0x200   :  { %v2210_v1 = vadd.f32 %v2204_v40, %v2200_v0  ;;  %v2278_v7 = vmax.f32 %v2219_v54, %v2274_v57  ;;  %v4143_v54 = vld [vmem:[%s6035_s8] ss:$0 sm:$0xff] }
 0x201   :  { %v2236_v60 = vmax.f32 %v2230_v44, %v2232_v17 }
 0x202   :  { %v2218_v8 = vmul.f32 0.01, %v2210_v1  ;;  %vm2214_vm12 = vcmp.gt.f32.partialorder %v2210_v1, 0.0  ;;  %v2284_v12 = vmax.f32 %v2278_v7, %v2280_v10  ;;  %v4175_v10 = vmov 12.0  }
 0x203   :  { %v4137_v32 = vpack.i.bf16 %v2236_v60, %v2235_v15  ;;  %2498 = vmatpush.bf16.msra.mxu2 %v4111_v61  ;;  %4144 = vrcp.f32 %v4175_v10 }
 0x204   :  { %v2222_v49 = vsel %vm2214_vm12, %v2210_v1, %v2218_v8 }
 0x205   :  { %v2275_v51 = vrot.slane %v2222_v49, 2  ;;  %v2281_v56 = vrot.slane %v2222_v49, 4 }
 0x207   :  { %v2279_v9 = vmax.f32 %v2220_v6, %v2275_v51  ;;  %2499 = vmatpush.bf16.msra.mxu2 %v4110_v62 }
 0x209   :  { %v2285_v28 = vmax.f32 %v2279_v9, %v2281_v56  ;;  %v4145_v56 = vpop.eup %4144 }
 0x20a   :  { %v2522_v11 = vmul.f32 12.0, %v4145_v56  ;;  %vm2526_vm1 = vweird.f32 %v4145_v56 }
 0x20b   :  { %v4132_v13 = vpack.i.bf16 %v2285_v28, %v2284_v12  ;;  %2500 = vmatpush.bf16.msra.mxu2 %v4109_v19 }
 0x20d   :  { %4133 = vrot.lane.b32.xlu1 %v4132_v13, %s4172_s26  ;;  %4123 = vrot.lane.b32.xlu0 %v4132_v13, %s4173_s27 }
 0x215   :  { %4138 = vrot.lane.b32.xlu1 %v4137_v32, %s4172_s26  ;;  %4128 = vrot.lane.b32.xlu0 %v4137_v32, %s4173_s27 }
 0x27f   :  { %v4134_v25 = vpop.permute.xlu1 %4133  ;;  %v4124_v27 = vpop.permute.xlu0 %4123 }
 0x280   :  { %v4136_v29 = vunpack.i.h.bf16 %v4134_v25  ;;  %v4135_v30 = vunpack.i.l.bf16 %v4134_v25  ;;  %v4126_v47 = vunpack.i.h.bf16 %v4124_v27  ;;  %v4125_v31 = vunpack.i.l.bf16 %v4124_v27 }
 0x282   :  { %v2292_v4 = vsel %vm2243_vm13, %v4125_v31, %v4126_v47  ;;  %v2299_v34 = vsel %vm2251_vm14, %v4135_v30, %v4136_v29 }
 0x283   :  { %v2294_v33 = vmax.f32 %v2284_v12, %v2292_v4  ;;  %v2523_v12 = vsub.f32 1.0, %v2522_v11 }
 0x285   :  { %v2301_v5 = vmax.f32 %v2294_v33, %v2299_v34  ;;  %v2524_v44 = vmul.f32 %v4145_v56, %v2523_v12 }
 0x287   :  { %v4139_v35 = vpop.permute.xlu1 %4138  ;;  %v4129_v36 = vpop.permute.xlu0 %4128  ;;  %v2302_v37 = vpack.c.bf16 %v2301_v5, %v2301_v5  ;;  %v2525_v52 = vadd.f32 %v4145_v56, %v2524_v44 }
 0x288   :  { %v4141_v38 = vunpack.i.h.bf16 %v4139_v35  ;;  %v4140_v39 = vunpack.i.l.bf16 %v4139_v35  ;;  %v4131_v40 = vunpack.i.h.bf16 %v4129_v36  ;;  %v4130_v18 = vunpack.i.l.bf16 %v4129_v36 }
 0x289   :  { %v2321_v41 = vrot.slane %v2302_v37, 3  ;;  %v2527_v32 = vsel %vm2526_vm1, %v4145_v56, %v2525_v52 }
 0x28a   :  { %v2244_v20 = vsel %vm2243_vm13, %v4130_v18, %v4131_v40  ;;  %v2252_v45 = vsel %vm2251_vm14, %v4140_v39, %v4141_v38 }
 0x28b   :  { %v2246_v42 = vmax.f32 %v2235_v15, %v2244_v20  ;;  %2379 = vmatmul.bf16.vlgmr.msra.gmra.mxu0 %v2321_v41 }
 0x28d   :  { %v2254_v48 = vmax.f32 %v2246_v42, %v2252_v45 }
 0x28f   :  { %v2255_v63 = vpack.c.bf16 %v2254_v48, %v2254_v48 }
 0x291   :  { %2440 = vmatmul.bf16.vlgmr.msra.gmra.mxu1 %v2255_v63 }
 0x308   :  { %v2380_v0 = vpop.f32.mrf.mxu0 }
 0x30e   :  { %v2441_v53 = vpop.f32.mrf.mxu1 }
 0x30f   :  { %v2442_v46 = vadd.f32 %v2441_v53, %v2380_v0 }
 0x310   :  { %v2382_v23 = vpop.f32.mrf.mxu0 }
 0x311   :  { %v2449_v3 = vadd.f32 %v4142_v50, %v2442_v46 }
 0x313   :  { %vm2450_vm15 = vcmp.gt.f32.partialorder %v2449_v3, 0.0  ;;  %v2451_v1 = vmul.f32 0.01, %v2449_v3 }
 0x315   :  { %v2452_v57 = vsel %vm2450_vm15, %v2449_v3, %v2451_v1 }
 0x316   :  { %v2453_v8 = vpack.c.bf16 %v2452_v57, %v2452_v57  ;;  %v2443_v43 = vpop.f32.mrf.mxu1 }
 0x318   :  { %3830 = vmatmul.msk.bf16.vlgmr.msra.gmra.mxu2 %vm2251_vm14, %v2453_v8 }
 0x39b   :  { %v2502_v6 = vpop.f32.mrf.mxu2 }
 0x39c   :  { %v2503_v49 = vadd.f32 %v4143_v54, %v2502_v6 }
 0x39e   :  { %2507 = vrot.lane.b32.xlu2 %v2503_v49, %s4174_s7 }
 0x3a3   :  { %v2504_v51 = vpop.f32.mrf.mxu2 }
 0x3f8   :  { %v2508_v7 = vpop.permute.xlu2 %2507 }
 0x3f9   :  { %v2511_v9 = vsel %vm2510_vm0, %v2508_v7, 0.0 }
 0x3fa   :  { %2512 = vadd.xlane.f32.xlu2 %v2511_v9 }
 0x46d   :  { %v2513_v28 = vpop.xlane.xlu2 %2512 }
 0x46e   :  { %v2514_v26 = vrot.slane %v2513_v28, 4 }
 0x470   :  { %v2515_v13 = vadd.f32 %v2514_v26, %v2513_v28 }
 0x472   :  { %v2516_v16 = vrot.slane %v2515_v13, 2 }
 0x474   :  { %v2517_v17 = vadd.f32 %v2516_v16, %v2515_v13 }
 0x476   :  { %v2518_v60 = vrot.slane %v2517_v17, 1 }
 0x478   :  { %v2519_v15 = vadd.f32 %v2518_v60, %v2517_v17 }
 0x47a   :  { %4113 = vpush %v2519_v15 }
 0x47b   :  { %4115 = vpush %v2527_v32 }
 0x4ab   :  { %s4114_s6 = spop %4113 }
 0x4ac   :  { %s4116_s8 = spop %4115 }
 0x4ad   :  { %s2529_s27 = smul.f32 %s4116_s8, %s4114_s6 }
 0x4af   :  { %v2530_v55 = vstv %s2529_s27 }
 0x4b0   :  { %v2531_v59 = vsub.f32 %v2503_v49, %v2530_v55 }
 0x4b2   :  { %2533 = vrot.lane.b32.xlu0 %v2531_v59, %s4174_s7 }
 0x524   :  { %v2534_v21 = vpop.permute.xlu0 %2533 }
 0x525   :  { %v2536_v22 = vadd.f32 %v2534_v21, %v2503_v49 }
 0x527   :  { %2537 = vst.msk [vmem:[#allocation2] sm:$0x3] %vm2510_vm0, %v2536_v22 }
 0x528   :  { %2548 = dma.vmem_to_hbm [thread:$0]  %s2544_s29, 32, %s2546_s3, [#allocation3]  }
 0x529   :  { %4170 = dma.done.wait [#allocation3], 32  }
 0x52a   :  { %4171 = vsyncadd [#allocation3], 4294967264 }
 0x52b   :  { %2553 = vsyncpa [#allocation3], 1 }

</bundles_post_ra>
